<compile_context>
chip_gen: v7x
topology: tpu7x:2x2x1
jax: 0.10.0
libtpu: 0.0.40
codegen_flags: <defaults>
</compile_context>

<pallas_src>
import math
from functools import partial

import jax
import jax.numpy as jnp
from jax import lax
from jax.experimental import pallas as pl
from jax.experimental.pallas import tpu as pltpu


# ------------------------------------------------------------------
# Fused kernel: per-batch QKV projection (all heads at once) + per-head
# scaled dot-product attention + head concat + output projection.
# Grid = (B,), one grid point per batch element.
# ------------------------------------------------------------------
def _fused_attn_kernel(xq_ref, xk_ref, xv_ref,
                       wq_ref, wk_ref, wv_ref, wp_ref,
                       out_ref, attn_ref, *, nheads, d_hid):
    # Ref shapes (leading batch dim squeezed by the BlockSpec):
    #   xq: (S, d_in)   xk/xv: (K, d_in)
    #   wq/wk/wv: (d_in, d_out)   pre-transposed; wk pre-scaled by 1/sqrt(d_hid)
    #   wp: (d_out, d_out)        pre-transposed
    #   out: (S, d_out)   attn: (H, S, K)
    xq = xq_ref[...]
    xk = xk_ref[...]
    xv = xv_ref[...]

    # 1x1 Conv1d projections == channel matmuls; one MXU matmul per tensor
    # covering all heads (fused, no per-head weight tiles).
    q = jnp.dot(xq, wq_ref[...], preferred_element_type=jnp.float32)   # (S, d_out)
    k = jnp.dot(xk, wk_ref[...], preferred_element_type=jnp.float32)   # (K, d_out), pre-scaled
    v = jnp.dot(xv, wv_ref[...], preferred_element_type=jnp.float32)   # (K, d_out)

    # Per-head attention: static unrolled loop over tiny head slices of the
    # already-projected activations (no grid axis, no extra DMAs).
    head_outs = []
    for h in range(nheads):
        lo, hi = h * d_hid, (h + 1) * d_hid
        qh = q[:, lo:hi]            # (S, d_hid)
        kh = k[:, lo:hi]            # (K, d_hid)
        vh = v[:, lo:hi]            # (K, d_hid)

        # scores: contract over d_hid without an explicit transpose of kh
        s = lax.dot_general(qh, kh, (((1,), (1,)), ((), ())),
                            preferred_element_type=jnp.float32)        # (S, K)
        s = s - jnp.max(s, axis=-1, keepdims=True)
        p = jnp.exp(s)
        # exact division: the attention matrix is a returned output and must
        # match the reference softmax bit-closely.
        p = p / jnp.sum(p, axis=-1, keepdims=True)

        attn_ref[h] = p                                                # (S, K)
        head_outs.append(jnp.dot(p, vh,
                                 preferred_element_type=jnp.float32))  # (S, d_hid)

    # 'b n s c -> b (n c) s' head-major concat, kept channel-last: (S, d_out)
    o = jnp.concatenate(head_outs, axis=-1)

    # fused output projection (proj Conv1d, no bias); lane-dense (d_out) store
    out_ref[...] = jnp.dot(o, wp_ref[...], preferred_element_type=jnp.float32)


def attention_forward(query_sbc, key_sbc, value_sbc, params, nheads):
    """query/key/value: (S, B, C) float32, like the PyTorch module.
    Returns (out (S, B, d_out), attn (B, H, S_q, S_k))."""
    wq, wk, wv, wp = params["wq"], params["wk"], params["wv"], params["wp"]
    d_out, d_in = wq.shape
    d_hid = d_out // nheads
    scale = 1.0 / math.sqrt(d_hid)

    S, B, _ = query_sbc.shape
    K = key_sbc.shape[0]

    # (S, B, C) -> (B, S, C)   [channel-last instead of PyTorch's NCW]
    xq = jnp.transpose(query_sbc, (1, 0, 2))
    xk = jnp.transpose(key_sbc, (1, 0, 2))
    xv = jnp.transpose(value_sbc, (1, 0, 2))

    # Host-side layout prep: pre-transpose weights to (d_in, d_out) so no XLU
    # transposes run inside the kernel; fold 1/sqrt(d_hid) into wk.
    wq_t = wq.T
    wk_t = (wk * scale).T
    wv_t = wv.T
    wp_t = wp.T

    kernel = partial(_fused_attn_kernel, nheads=nheads, d_hid=d_hid)

    out_bsc, attn = pl.pallas_call(
        kernel,
        out_shape=(
            jax.ShapeDtypeStruct((B, S, d_out), jnp.float32),
            jax.ShapeDtypeStruct((B, nheads, S, K), jnp.float32),
        ),
        grid_spec=pltpu.PrefetchScalarGridSpec(
            num_scalar_prefetch=0,
            grid=(B,),
            in_specs=[
                pl.BlockSpec((pl.Squeezed(), S, d_in), lambda b: (b, 0, 0)),
                pl.BlockSpec((pl.Squeezed(), K, d_in), lambda b: (b, 0, 0)),
                pl.BlockSpec((pl.Squeezed(), K, d_in), lambda b: (b, 0, 0)),
                pl.BlockSpec((d_in, d_out), lambda b: (0, 0)),
                pl.BlockSpec((d_in, d_out), lambda b: (0, 0)),
                pl.BlockSpec((d_in, d_out), lambda b: (0, 0)),
                pl.BlockSpec((d_out, d_out), lambda b: (0, 0)),
            ],
            out_specs=[
                pl.BlockSpec((pl.Squeezed(), S, d_out), lambda b: (b, 0, 0)),
                pl.BlockSpec((pl.Squeezed(), nheads, S, K),
                             lambda b: (b, 0, 0, 0)),
            ],
        ),
        compiler_params=pltpu.CompilerParams(
            dimension_semantics=("parallel",)),
    )(xq, xk, xv, wq_t, wk_t, wv_t, wp_t)

    # 'b c s -> s b c'  (already channel-last, so just swap b/s)
    out_sbc = jnp.transpose(out_bsc, (1, 0, 2))
    return out_sbc, attn


def xavier_uniform(key, fan_out, fan_in):
    bound = math.sqrt(6.0 / (fan_in + fan_out))
    return jax.random.uniform(key, (fan_out, fan_in), jnp.float32, -bound, bound)


if __name__ == "__main__":
    # Module config (defaults: kernel_size=1, rel_pos_type=None)
    d_in, d_out, nheads = 32, 32, 8
    S, B = 8, 2
    d_hid = d_out // nheads

    key = jax.random.PRNGKey(0)
    kq, kk, kv, kp, kx1, kx2, kx3 = jax.random.split(key, 7)

    params = {
        "wq": xavier_uniform(kq, d_out, d_in),   # Conv1d(d_in, d_out, 1).weight squeezed
        "wk": xavier_uniform(kk, d_out, d_in),
        "wv": xavier_uniform(kv, d_out, d_in),
        "wp": xavier_uniform(kp, d_out, d_out),  # proj Conv1d(d_out, d_out, 1)
    }

    # forward inputs are (S, B, C), like the PyTorch module
    query = jax.random.normal(kx1, (S, B, d_in), jnp.float32)
    keyt = jax.random.normal(kx2, (S, B, d_in), jnp.float32)
    value = jax.random.normal(kx3, (S, B, d_in), jnp.float32)

    out, attn = attention_forward(query, keyt, value, params, nheads)
    out = jax.block_until_ready(out)
    attn = jax.block_until_ready(attn)

    # pure-JAX reference for sanity (mirrors the PyTorch forward exactly)
    def ref_forward(q, k, v):
        xq = jnp.transpose(q, (1, 0, 2))
        xk = jnp.transpose(k, (1, 0, 2))
        xv = jnp.transpose(v, (1, 0, 2))
        eq = (xq @ params["wq"].T).reshape(B, S, nheads, d_hid).transpose(0, 2, 1, 3)
        ek = (xk @ params["wk"].T).reshape(B, S, nheads, d_hid).transpose(0, 2, 1, 3)
        ev = (xv @ params["wv"].T).reshape(B, S, nheads, d_hid).transpose(0, 2, 1, 3)
        ek = ek / math.sqrt(d_hid)
        a = jnp.einsum("bhnk,bhmk->bhnm", eq, ek)
        a = jax.nn.softmax(a, axis=-1)
        o = jnp.einsum("bhnm,bhmv->bhnv", a, ev)
        o = o.transpose(0, 2, 1, 3).reshape(B, S, d_out)
        o = o @ params["wp"].T
        return jnp.transpose(o, (1, 0, 2)), a

    ref_out, ref_attn = ref_forward(query, keyt, value)
    assert out.shape == (S, B, d_out) and attn.shape == (B, nheads, S, S)
    assert jnp.allclose(out, ref_out, atol=1e-4, rtol=1e-4)
    assert jnp.allclose(attn, ref_attn, atol=1e-4, rtol=1e-4)

    print("KERNEL_OK")
</pallas_src>

<mosaic_0001>
module attributes {stable_mosaic.version = 11 : i64} {
  func.func @_fused_attn_kernel(%arg0: i32, %arg1: memref<1x8x32xf32, #tpu.memory_space<vmem>>, %arg2: memref<1x8x32xf32, #tpu.memory_space<vmem>>, %arg3: memref<1x8x32xf32, #tpu.memory_space<vmem>>, %arg4: memref<32x32xf32, #tpu.memory_space<vmem>>, %arg5: memref<32x32xf32, #tpu.memory_space<vmem>>, %arg6: memref<32x32xf32, #tpu.memory_space<vmem>>, %arg7: memref<32x32xf32, #tpu.memory_space<vmem>>, %arg8: memref<1x8x32xf32, #tpu.memory_space<vmem>>, %arg9: memref<1x8x8x8xf32, #tpu.memory_space<vmem>>) attributes {dimension_semantics = [#tpu.dimension_semantics<parallel>], iteration_bounds = array<i64: 2>, scalar_prefetch = 0 : i64, scratch_operands = 0 : i64, tpu.core_type = #tpu.core_type<tc>, window_params = [{transform_indices = @transform_0, window_bounds = array<i64: 1, 8, 32>}, {transform_indices = @transform_1, window_bounds = array<i64: 1, 8, 32>}, {transform_indices = @transform_2, window_bounds = array<i64: 1, 8, 32>}, {pipeline_mode = #tpu.pipeline_mode<synchronous>, transform_indices = @transform_3, window_bounds = array<i64: 32, 32>}, {pipeline_mode = #tpu.pipeline_mode<synchronous>, transform_indices = @transform_4, window_bounds = array<i64: 32, 32>}, {pipeline_mode = #tpu.pipeline_mode<synchronous>, transform_indices = @transform_5, window_bounds = array<i64: 32, 32>}, {pipeline_mode = #tpu.pipeline_mode<synchronous>, transform_indices = @transform_6, window_bounds = array<i64: 32, 32>}, {transform_indices = @transform_7, window_bounds = array<i64: 1, 8, 32>}, {transform_indices = @transform_8, window_bounds = array<i64: 1, 8, 8, 8>}]} {
    %c0 = arith.constant 0 : index
    %c0_0 = arith.constant 0 : index
    %c0_1 = arith.constant 0 : index
    %0 = vector.load %arg1[%c0, %c0_0, %c0_1] : memref<1x8x32xf32, #tpu.memory_space<vmem>>, vector<1x8x32xf32>
    %1 = vector.shape_cast %0 : vector<1x8x32xf32> to vector<8x32xf32>
    %c0_2 = arith.constant 0 : index
    %c0_3 = arith.constant 0 : index
    %c0_4 = arith.constant 0 : index
    %2 = vector.load %arg2[%c0_2, %c0_3, %c0_4] : memref<1x8x32xf32, #tpu.memory_space<vmem>>, vector<1x8x32xf32>
    %3 = vector.shape_cast %2 : vector<1x8x32xf32> to vector<8x32xf32>
    %c0_5 = arith.constant 0 : index
    %c0_6 = arith.constant 0 : index
    %c0_7 = arith.constant 0 : index
    %4 = vector.load %arg3[%c0_5, %c0_6, %c0_7] : memref<1x8x32xf32, #tpu.memory_space<vmem>>, vector<1x8x32xf32>
    %5 = vector.shape_cast %4 : vector<1x8x32xf32> to vector<8x32xf32>
    %c0_8 = arith.constant 0 : index
    %c0_9 = arith.constant 0 : index
    %6 = vector.load %arg4[%c0_8, %c0_9] : memref<32x32xf32, #tpu.memory_space<vmem>>, vector<32x32xf32>
    %cst = arith.constant dense<0.000000e+00> : vector<8x32xf32>
    %7 = tpu.matmul %1, %6, %cst {dimension_numbers = #tpu.dot_dimension_numbers<[1], [0], [0], [1], [0, 0, 1, 1], [], []>} : vector<8x32xf32>, vector<32x32xf32>, vector<8x32xf32> -> vector<8x32xf32>
    %c0_10 = arith.constant 0 : index
    %c0_11 = arith.constant 0 : index
    %8 = vector.load %arg5[%c0_10, %c0_11] : memref<32x32xf32, #tpu.memory_space<vmem>>, vector<32x32xf32>
    %cst_12 = arith.constant dense<0.000000e+00> : vector<8x32xf32>
    %9 = tpu.matmul %3, %8, %cst_12 {dimension_numbers = #tpu.dot_dimension_numbers<[1], [0], [0], [1], [0, 0, 1, 1], [], []>} : vector<8x32xf32>, vector<32x32xf32>, vector<8x32xf32> -> vector<8x32xf32>
    %c0_13 = arith.constant 0 : index
    %c0_14 = arith.constant 0 : index
    %10 = vector.load %arg6[%c0_13, %c0_14] : memref<32x32xf32, #tpu.memory_space<vmem>>, vector<32x32xf32>
    %cst_15 = arith.constant dense<0.000000e+00> : vector<8x32xf32>
    %11 = tpu.matmul %5, %10, %cst_15 {dimension_numbers = #tpu.dot_dimension_numbers<[1], [0], [0], [1], [0, 0, 1, 1], [], []>} : vector<8x32xf32>, vector<32x32xf32>, vector<8x32xf32> -> vector<8x32xf32>
    %12 = vector.extract_strided_slice %7 {offsets = [0, 0], sizes = [8, 4], strides = [1, 1]} : vector<8x32xf32> to vector<8x4xf32>
    %13 = vector.extract_strided_slice %9 {offsets = [0, 0], sizes = [8, 4], strides = [1, 1]} : vector<8x32xf32> to vector<8x4xf32>
    %14 = vector.extract_strided_slice %11 {offsets = [0, 0], sizes = [8, 4], strides = [1, 1]} : vector<8x32xf32> to vector<8x4xf32>
    %cst_16 = arith.constant dense<0.000000e+00> : vector<8x8xf32>
    %15 = tpu.matmul %12, %13, %cst_16 {dimension_numbers = #tpu.dot_dimension_numbers<[1], [1], [0], [0], [0, 0, 1, 0], [], []>} : vector<8x4xf32>, vector<8x4xf32>, vector<8x8xf32> -> vector<8x8xf32>
    %cst_17 = arith.constant dense<0xFF800000> : vector<8xf32>
    %16 = vector.multi_reduction <maximumf>, %15, %cst_17 [1] : vector<8x8xf32> to vector<8xf32>
    %17 = vector.shape_cast %16 : vector<8xf32> to vector<8x1xf32>
    %18 = vector.broadcast %17 : vector<8x1xf32> to vector<8x8xf32>
    %19 = arith.subf %15, %18 : vector<8x8xf32>
    %20 = math.exp %19 : vector<8x8xf32>
    %cst_18 = arith.constant dense<0.000000e+00> : vector<8xf32>
    %21 = vector.multi_reduction <add>, %20, %cst_18 [1] : vector<8x8xf32> to vector<8xf32>
    %22 = vector.shape_cast %21 : vector<8xf32> to vector<8x1xf32>
    %23 = vector.broadcast %22 : vector<8x1xf32> to vector<8x8xf32>
    %24 = arith.divf %20, %23 : vector<8x8xf32>
    %c0_19 = arith.constant 0 : index
    %c0_20 = arith.constant 0 : index
    %c0_21 = arith.constant 0 : index
    %c0_22 = arith.constant 0 : index
    %25 = vector.load %arg9[%c0_19, %c0_20, %c0_21, %c0_22] : memref<1x8x8x8xf32, #tpu.memory_space<vmem>>, vector<1x1x8x8xf32>
    %26 = vector.shape_cast %25 : vector<1x1x8x8xf32> to vector<8x8xf32>
    %27 = vector.shape_cast %24 : vector<8x8xf32> to vector<1x1x8x8xf32>
    tpu.vector_store %arg9[%c0_19, %c0_20, %c0_21, %c0_22], %27 {strides = array<i32>} : memref<1x8x8x8xf32, #tpu.memory_space<vmem>>, vector<1x1x8x8xf32>,
    %cst_23 = arith.constant dense<0.000000e+00> : vector<8x4xf32>
    %28 = tpu.matmul %24, %14, %cst_23 {dimension_numbers = #tpu.dot_dimension_numbers<[1], [0], [0], [1], [0, 0, 1, 1], [], []>} : vector<8x8xf32>, vector<8x4xf32>, vector<8x4xf32> -> vector<8x4xf32>
    %29 = vector.extract_strided_slice %7 {offsets = [0, 4], sizes = [8, 4], strides = [1, 1]} : vector<8x32xf32> to vector<8x4xf32>
    %30 = vector.extract_strided_slice %9 {offsets = [0, 4], sizes = [8, 4], strides = [1, 1]} : vector<8x32xf32> to vector<8x4xf32>
    %31 = vector.extract_strided_slice %11 {offsets = [0, 4], sizes = [8, 4], strides = [1, 1]} : vector<8x32xf32> to vector<8x4xf32>
    %cst_24 = arith.constant dense<0.000000e+00> : vector<8x8xf32>
    %32 = tpu.matmul %29, %30, %cst_24 {dimension_numbers = #tpu.dot_dimension_numbers<[1], [1], [0], [0], [0, 0, 1, 0], [], []>} : vector<8x4xf32>, vector<8x4xf32>, vector<8x8xf32> -> vector<8x8xf32>
    %cst_25 = arith.constant dense<0xFF800000> : vector<8xf32>
    %33 = vector.multi_reduction <maximumf>, %32, %cst_25 [1] : vector<8x8xf32> to vector<8xf32>
    %34 = vector.shape_cast %33 : vector<8xf32> to vector<8x1xf32>
    %35 = vector.broadcast %34 : vector<8x1xf32> to vector<8x8xf32>
    %36 = arith.subf %32, %35 : vector<8x8xf32>
    %37 = math.exp %36 : vector<8x8xf32>
    %cst_26 = arith.constant dense<0.000000e+00> : vector<8xf32>
    %38 = vector.multi_reduction <add>, %37, %cst_26 [1] : vector<8x8xf32> to vector<8xf32>
    %39 = vector.shape_cast %38 : vector<8xf32> to vector<8x1xf32>
    %40 = vector.broadcast %39 : vector<8x1xf32> to vector<8x8xf32>
    %41 = arith.divf %37, %40 : vector<8x8xf32>
    %c0_27 = arith.constant 0 : index
    %c1 = arith.constant 1 : index
    %c0_28 = arith.constant 0 : index
    %c0_29 = arith.constant 0 : index
    %42 = vector.load %arg9[%c0_27, %c1, %c0_28, %c0_29] : memref<1x8x8x8xf32, #tpu.memory_space<vmem>>, vector<1x1x8x8xf32>
    %43 = vector.shape_cast %42 : vector<1x1x8x8xf32> to vector<8x8xf32>
    %44 = vector.shape_cast %41 : vector<8x8xf32> to vector<1x1x8x8xf32>
    tpu.vector_store %arg9[%c0_27, %c1, %c0_28, %c0_29], %44 {strides = array<i32>} : memref<1x8x8x8xf32, #tpu.memory_space<vmem>>, vector<1x1x8x8xf32>,
    %cst_30 = arith.constant dense<0.000000e+00> : vector<8x4xf32>
    %45 = tpu.matmul %41, %31, %cst_30 {dimension_numbers = #tpu.dot_dimension_numbers<[1], [0], [0], [1], [0, 0, 1, 1], [], []>} : vector<8x8xf32>, vector<8x4xf32>, vector<8x4xf32> -> vector<8x4xf32>
    %46 = vector.extract_strided_slice %7 {offsets = [0, 8], sizes = [8, 4], strides = [1, 1]} : vector<8x32xf32> to vector<8x4xf32>
    %47 = vector.extract_strided_slice %9 {offsets = [0, 8], sizes = [8, 4], strides = [1, 1]} : vector<8x32xf32> to vector<8x4xf32>
    %48 = vector.extract_strided_slice %11 {offsets = [0, 8], sizes = [8, 4], strides = [1, 1]} : vector<8x32xf32> to vector<8x4xf32>
    %cst_31 = arith.constant dense<0.000000e+00> : vector<8x8xf32>
    %49 = tpu.matmul %46, %47, %cst_31 {dimension_numbers = #tpu.dot_dimension_numbers<[1], [1], [0], [0], [0, 0, 1, 0], [], []>} : vector<8x4xf32>, vector<8x4xf32>, vector<8x8xf32> -> vector<8x8xf32>
    %cst_32 = arith.constant dense<0xFF800000> : vector<8xf32>
    %50 = vector.multi_reduction <maximumf>, %49, %cst_32 [1] : vector<8x8xf32> to vector<8xf32>
    %51 = vector.shape_cast %50 : vector<8xf32> to vector<8x1xf32>
    %52 = vector.broadcast %51 : vector<8x1xf32> to vector<8x8xf32>
    %53 = arith.subf %49, %52 : vector<8x8xf32>
    %54 = math.exp %53 : vector<8x8xf32>
    %cst_33 = arith.constant dense<0.000000e+00> : vector<8xf32>
    %55 = vector.multi_reduction <add>, %54, %cst_33 [1] : vector<8x8xf32> to vector<8xf32>
    %56 = vector.shape_cast %55 : vector<8xf32> to vector<8x1xf32>
    %57 = vector.broadcast %56 : vector<8x1xf32> to vector<8x8xf32>
    %58 = arith.divf %54, %57 : vector<8x8xf32>
    %c0_34 = arith.constant 0 : index
    %c2 = arith.constant 2 : index
    %c0_35 = arith.constant 0 : index
    %c0_36 = arith.constant 0 : index
    %59 = vector.load %arg9[%c0_34, %c2, %c0_35, %c0_36] : memref<1x8x8x8xf32, #tpu.memory_space<vmem>>, vector<1x1x8x8xf32>
    %60 = vector.shape_cast %59 : vector<1x1x8x8xf32> to vector<8x8xf32>
    %61 = vector.shape_cast %58 : vector<8x8xf32> to vector<1x1x8x8xf32>
    tpu.vector_store %arg9[%c0_34, %c2, %c0_35, %c0_36], %61 {strides = array<i32>} : memref<1x8x8x8xf32, #tpu.memory_space<vmem>>, vector<1x1x8x8xf32>,
    %cst_37 = arith.constant dense<0.000000e+00> : vector<8x4xf32>
    %62 = tpu.matmul %58, %48, %cst_37 {dimension_numbers = #tpu.dot_dimension_numbers<[1], [0], [0], [1], [0, 0, 1, 1], [], []>} : vector<8x8xf32>, vector<8x4xf32>, vector<8x4xf32> -> vector<8x4xf32>
    %63 = vector.extract_strided_slice %7 {offsets = [0, 12], sizes = [8, 4], strides = [1, 1]} : vector<8x32xf32> to vector<8x4xf32>
    %64 = vector.extract_strided_slice %9 {offsets = [0, 12], sizes = [8, 4], strides = [1, 1]} : vector<8x32xf32> to vector<8x4xf32>
    %65 = vector.extract_strided_slice %11 {offsets = [0, 12], sizes = [8, 4], strides = [1, 1]} : vector<8x32xf32> to vector<8x4xf32>
    %cst_38 = arith.constant dense<0.000000e+00> : vector<8x8xf32>
    %66 = tpu.matmul %63, %64, %cst_38 {dimension_numbers = #tpu.dot_dimension_numbers<[1], [1], [0], [0], [0, 0, 1, 0], [], []>} : vector<8x4xf32>, vector<8x4xf32>, vector<8x8xf32> -> vector<8x8xf32>
    %cst_39 = arith.constant dense<0xFF800000> : vector<8xf32>
    %67 = vector.multi_reduction <maximumf>, %66, %cst_39 [1] : vector<8x8xf32> to vector<8xf32>
    %68 = vector.shape_cast %67 : vector<8xf32> to vector<8x1xf32>
    %69 = vector.broadcast %68 : vector<8x1xf32> to vector<8x8xf32>
    %70 = arith.subf %66, %69 : vector<8x8xf32>
    %71 = math.exp %70 : vector<8x8xf32>
    %cst_40 = arith.constant dense<0.000000e+00> : vector<8xf32>
    %72 = vector.multi_reduction <add>, %71, %cst_40 [1] : vector<8x8xf32> to vector<8xf32>
    %73 = vector.shape_cast %72 : vector<8xf32> to vector<8x1xf32>
    %74 = vector.broadcast %73 : vector<8x1xf32> to vector<8x8xf32>
    %75 = arith.divf %71, %74 : vector<8x8xf32>
    %c0_41 = arith.constant 0 : index
    %c3 = arith.constant 3 : index
    %c0_42 = arith.constant 0 : index
    %c0_43 = arith.constant 0 : index
    %76 = vector.load %arg9[%c0_41, %c3, %c0_42, %c0_43] : memref<1x8x8x8xf32, #tpu.memory_space<vmem>>, vector<1x1x8x8xf32>
    %77 = vector.shape_cast %76 : vector<1x1x8x8xf32> to vector<8x8xf32>
    %78 = vector.shape_cast %75 : vector<8x8xf32> to vector<1x1x8x8xf32>
    tpu.vector_store %arg9[%c0_41, %c3, %c0_42, %c0_43], %78 {strides = array<i32>} : memref<1x8x8x8xf32, #tpu.memory_space<vmem>>, vector<1x1x8x8xf32>,
    %cst_44 = arith.constant dense<0.000000e+00> : vector<8x4xf32>
    %79 = tpu.matmul %75, %65, %cst_44 {dimension_numbers = #tpu.dot_dimension_numbers<[1], [0], [0], [1], [0, 0, 1, 1], [], []>} : vector<8x8xf32>, vector<8x4xf32>, vector<8x4xf32> -> vector<8x4xf32>
    %80 = vector.extract_strided_slice %7 {offsets = [0, 16], sizes = [8, 4], strides = [1, 1]} : vector<8x32xf32> to vector<8x4xf32>
    %81 = vector.extract_strided_slice %9 {offsets = [0, 16], sizes = [8, 4], strides = [1, 1]} : vector<8x32xf32> to vector<8x4xf32>
    %82 = vector.extract_strided_slice %11 {offsets = [0, 16], sizes = [8, 4], strides = [1, 1]} : vector<8x32xf32> to vector<8x4xf32>
    %cst_45 = arith.constant dense<0.000000e+00> : vector<8x8xf32>
    %83 = tpu.matmul %80, %81, %cst_45 {dimension_numbers = #tpu.dot_dimension_numbers<[1], [1], [0], [0], [0, 0, 1, 0], [], []>} : vector<8x4xf32>, vector<8x4xf32>, vector<8x8xf32> -> vector<8x8xf32>
    %cst_46 = arith.constant dense<0xFF800000> : vector<8xf32>
    %84 = vector.multi_reduction <maximumf>, %83, %cst_46 [1] : vector<8x8xf32> to vector<8xf32>
    %85 = vector.shape_cast %84 : vector<8xf32> to vector<8x1xf32>
    %86 = vector.broadcast %85 : vector<8x1xf32> to vector<8x8xf32>
    %87 = arith.subf %83, %86 : vector<8x8xf32>
    %88 = math.exp %87 : vector<8x8xf32>
    %cst_47 = arith.constant dense<0.000000e+00> : vector<8xf32>
    %89 = vector.multi_reduction <add>, %88, %cst_47 [1] : vector<8x8xf32> to vector<8xf32>
    %90 = vector.shape_cast %89 : vector<8xf32> to vector<8x1xf32>
    %91 = vector.broadcast %90 : vector<8x1xf32> to vector<8x8xf32>
    %92 = arith.divf %88, %91 : vector<8x8xf32>
    %c0_48 = arith.constant 0 : index
    %c4 = arith.constant 4 : index
    %c0_49 = arith.constant 0 : index
    %c0_50 = arith.constant 0 : index
    %93 = vector.load %arg9[%c0_48, %c4, %c0_49, %c0_50] : memref<1x8x8x8xf32, #tpu.memory_space<vmem>>, vector<1x1x8x8xf32>
    %94 = vector.shape_cast %93 : vector<1x1x8x8xf32> to vector<8x8xf32>
    %95 = vector.shape_cast %92 : vector<8x8xf32> to vector<1x1x8x8xf32>
    tpu.vector_store %arg9[%c0_48, %c4, %c0_49, %c0_50], %95 {strides = array<i32>} : memref<1x8x8x8xf32, #tpu.memory_space<vmem>>, vector<1x1x8x8xf32>,
    %cst_51 = arith.constant dense<0.000000e+00> : vector<8x4xf32>
    %96 = tpu.matmul %92, %82, %cst_51 {dimension_numbers = #tpu.dot_dimension_numbers<[1], [0], [0], [1], [0, 0, 1, 1], [], []>} : vector<8x8xf32>, vector<8x4xf32>, vector<8x4xf32> -> vector<8x4xf32>
    %97 = vector.extract_strided_slice %7 {offsets = [0, 20], sizes = [8, 4], strides = [1, 1]} : vector<8x32xf32> to vector<8x4xf32>
    %98 = vector.extract_strided_slice %9 {offsets = [0, 20], sizes = [8, 4], strides = [1, 1]} : vector<8x32xf32> to vector<8x4xf32>
    %99 = vector.extract_strided_slice %11 {offsets = [0, 20], sizes = [8, 4], strides = [1, 1]} : vector<8x32xf32> to vector<8x4xf32>
    %cst_52 = arith.constant dense<0.000000e+00> : vector<8x8xf32>
    %100 = tpu.matmul %97, %98, %cst_52 {dimension_numbers = #tpu.dot_dimension_numbers<[1], [1], [0], [0], [0, 0, 1, 0], [], []>} : vector<8x4xf32>, vector<8x4xf32>, vector<8x8xf32> -> vector<8x8xf32>
    %cst_53 = arith.constant dense<0xFF800000> : vector<8xf32>
    %101 = vector.multi_reduction <maximumf>, %100, %cst_53 [1] : vector<8x8xf32> to vector<8xf32>
    %102 = vector.shape_cast %101 : vector<8xf32> to vector<8x1xf32>
    %103 = vector.broadcast %102 : vector<8x1xf32> to vector<8x8xf32>
    %104 = arith.subf %100, %103 : vector<8x8xf32>
    %105 = math.exp %104 : vector<8x8xf32>
    %cst_54 = arith.constant dense<0.000000e+00> : vector<8xf32>
    %106 = vector.multi_reduction <add>, %105, %cst_54 [1] : vector<8x8xf32> to vector<8xf32>
    %107 = vector.shape_cast %106 : vector<8xf32> to vector<8x1xf32>
    %108 = vector.broadcast %107 : vector<8x1xf32> to vector<8x8xf32>
    %109 = arith.divf %105, %108 : vector<8x8xf32>
    %c0_55 = arith.constant 0 : index
    %c5 = arith.constant 5 : index
    %c0_56 = arith.constant 0 : index
    %c0_57 = arith.constant 0 : index
    %110 = vector.load %arg9[%c0_55, %c5, %c0_56, %c0_57] : memref<1x8x8x8xf32, #tpu.memory_space<vmem>>, vector<1x1x8x8xf32>
    %111 = vector.shape_cast %110 : vector<1x1x8x8xf32> to vector<8x8xf32>
    %112 = vector.shape_cast %109 : vector<8x8xf32> to vector<1x1x8x8xf32>
    tpu.vector_store %arg9[%c0_55, %c5, %c0_56, %c0_57], %112 {strides = array<i32>} : memref<1x8x8x8xf32, #tpu.memory_space<vmem>>, vector<1x1x8x8xf32>,
    %cst_58 = arith.constant dense<0.000000e+00> : vector<8x4xf32>
    %113 = tpu.matmul %109, %99, %cst_58 {dimension_numbers = #tpu.dot_dimension_numbers<[1], [0], [0], [1], [0, 0, 1, 1], [], []>} : vector<8x8xf32>, vector<8x4xf32>, vector<8x4xf32> -> vector<8x4xf32>
    %114 = vector.extract_strided_slice %7 {offsets = [0, 24], sizes = [8, 4], strides = [1, 1]} : vector<8x32xf32> to vector<8x4xf32>
    %115 = vector.extract_strided_slice %9 {offsets = [0, 24], sizes = [8, 4], strides = [1, 1]} : vector<8x32xf32> to vector<8x4xf32>
    %116 = vector.extract_strided_slice %11 {offsets = [0, 24], sizes = [8, 4], strides = [1, 1]} : vector<8x32xf32> to vector<8x4xf32>
    %cst_59 = arith.constant dense<0.000000e+00> : vector<8x8xf32>
    %117 = tpu.matmul %114, %115, %cst_59 {dimension_numbers = #tpu.dot_dimension_numbers<[1], [1], [0], [0], [0, 0, 1, 0], [], []>} : vector<8x4xf32>, vector<8x4xf32>, vector<8x8xf32> -> vector<8x8xf32>
    %cst_60 = arith.constant dense<0xFF800000> : vector<8xf32>
    %118 = vector.multi_reduction <maximumf>, %117, %cst_60 [1] : vector<8x8xf32> to vector<8xf32>
    %119 = vector.shape_cast %118 : vector<8xf32> to vector<8x1xf32>
    %120 = vector.broadcast %119 : vector<8x1xf32> to vector<8x8xf32>
    %121 = arith.subf %117, %120 : vector<8x8xf32>
    %122 = math.exp %121 : vector<8x8xf32>
    %cst_61 = arith.constant dense<0.000000e+00> : vector<8xf32>
    %123 = vector.multi_reduction <add>, %122, %cst_61 [1] : vector<8x8xf32> to vector<8xf32>
    %124 = vector.shape_cast %123 : vector<8xf32> to vector<8x1xf32>
    %125 = vector.broadcast %124 : vector<8x1xf32> to vector<8x8xf32>
    %126 = arith.divf %122, %125 : vector<8x8xf32>
    %c0_62 = arith.constant 0 : index
    %c6 = arith.constant 6 : index
    %c0_63 = arith.constant 0 : index
    %c0_64 = arith.constant 0 : index
    %127 = vector.load %arg9[%c0_62, %c6, %c0_63, %c0_64] : memref<1x8x8x8xf32, #tpu.memory_space<vmem>>, vector<1x1x8x8xf32>
    %128 = vector.shape_cast %127 : vector<1x1x8x8xf32> to vector<8x8xf32>
    %129 = vector.shape_cast %126 : vector<8x8xf32> to vector<1x1x8x8xf32>
    tpu.vector_store %arg9[%c0_62, %c6, %c0_63, %c0_64], %129 {strides = array<i32>} : memref<1x8x8x8xf32, #tpu.memory_space<vmem>>, vector<1x1x8x8xf32>,
    %cst_65 = arith.constant dense<0.000000e+00> : vector<8x4xf32>
    %130 = tpu.matmul %126, %116, %cst_65 {dimension_numbers = #tpu.dot_dimension_numbers<[1], [0], [0], [1], [0, 0, 1, 1], [], []>} : vector<8x8xf32>, vector<8x4xf32>, vector<8x4xf32> -> vector<8x4xf32>
    %131 = vector.extract_strided_slice %7 {offsets = [0, 28], sizes = [8, 4], strides = [1, 1]} : vector<8x32xf32> to vector<8x4xf32>
    %132 = vector.extract_strided_slice %9 {offsets = [0, 28], sizes = [8, 4], strides = [1, 1]} : vector<8x32xf32> to vector<8x4xf32>
    %133 = vector.extract_strided_slice %11 {offsets = [0, 28], sizes = [8, 4], strides = [1, 1]} : vector<8x32xf32> to vector<8x4xf32>
    %cst_66 = arith.constant dense<0.000000e+00> : vector<8x8xf32>
    %134 = tpu.matmul %131, %132, %cst_66 {dimension_numbers = #tpu.dot_dimension_numbers<[1], [1], [0], [0], [0, 0, 1, 0], [], []>} : vector<8x4xf32>, vector<8x4xf32>, vector<8x8xf32> -> vector<8x8xf32>
    %cst_67 = arith.constant dense<0xFF800000> : vector<8xf32>
    %135 = vector.multi_reduction <maximumf>, %134, %cst_67 [1] : vector<8x8xf32> to vector<8xf32>
    %136 = vector.shape_cast %135 : vector<8xf32> to vector<8x1xf32>
    %137 = vector.broadcast %136 : vector<8x1xf32> to vector<8x8xf32>
    %138 = arith.subf %134, %137 : vector<8x8xf32>
    %139 = math.exp %138 : vector<8x8xf32>
    %cst_68 = arith.constant dense<0.000000e+00> : vector<8xf32>
    %140 = vector.multi_reduction <add>, %139, %cst_68 [1] : vector<8x8xf32> to vector<8xf32>
    %141 = vector.shape_cast %140 : vector<8xf32> to vector<8x1xf32>
    %142 = vector.broadcast %141 : vector<8x1xf32> to vector<8x8xf32>
    %143 = arith.divf %139, %142 : vector<8x8xf32>
    %c0_69 = arith.constant 0 : index
    %c7 = arith.constant 7 : index
    %c0_70 = arith.constant 0 : index
    %c0_71 = arith.constant 0 : index
    %144 = vector.load %arg9[%c0_69, %c7, %c0_70, %c0_71] : memref<1x8x8x8xf32, #tpu.memory_space<vmem>>, vector<1x1x8x8xf32>
    %145 = vector.shape_cast %144 : vector<1x1x8x8xf32> to vector<8x8xf32>
    %146 = vector.shape_cast %143 : vector<8x8xf32> to vector<1x1x8x8xf32>
    tpu.vector_store %arg9[%c0_69, %c7, %c0_70, %c0_71], %146 {strides = array<i32>} : memref<1x8x8x8xf32, #tpu.memory_space<vmem>>, vector<1x1x8x8xf32>,
    %cst_72 = arith.constant dense<0.000000e+00> : vector<8x4xf32>
    %147 = tpu.matmul %143, %133, %cst_72 {dimension_numbers = #tpu.dot_dimension_numbers<[1], [0], [0], [1], [0, 0, 1, 1], [], []>} : vector<8x8xf32>, vector<8x4xf32>, vector<8x4xf32> -> vector<8x4xf32>
    %148 = tpu.concatenate %28, %45, %62, %79, %96, %113, %130, %147 in 1 : vector<8x4xf32>, vector<8x4xf32>, vector<8x4xf32>, vector<8x4xf32>, vector<8x4xf32>, vector<8x4xf32>, vector<8x4xf32>, vector<8x4xf32> -> vector<8x32xf32>
    %c0_73 = arith.constant 0 : index
    %c0_74 = arith.constant 0 : index
    %149 = vector.load %arg7[%c0_73, %c0_74] : memref<32x32xf32, #tpu.memory_space<vmem>>, vector<32x32xf32>
    %cst_75 = arith.constant dense<0.000000e+00> : vector<8x32xf32>
    %150 = tpu.matmul %148, %149, %cst_75 {dimension_numbers = #tpu.dot_dimension_numbers<[1], [0], [0], [1], [0, 0, 1, 1], [], []>} : vector<8x32xf32>, vector<32x32xf32>, vector<8x32xf32> -> vector<8x32xf32>
    %c0_76 = arith.constant 0 : index
    %c0_77 = arith.constant 0 : index
    %c0_78 = arith.constant 0 : index
    %151 = vector.load %arg8[%c0_76, %c0_77, %c0_78] : memref<1x8x32xf32, #tpu.memory_space<vmem>>, vector<1x8x32xf32>
    %152 = vector.shape_cast %151 : vector<1x8x32xf32> to vector<8x32xf32>
    %153 = vector.shape_cast %150 : vector<8x32xf32> to vector<1x8x32xf32>
    tpu.vector_store %arg8[%c0_76, %c0_77, %c0_78], %153 {strides = array<i32>} : memref<1x8x32xf32, #tpu.memory_space<vmem>>, vector<1x8x32xf32>,
    return
  }
  func.func @transform_0(%arg0: i32) -> (i32, i32, i32) {
    %c0_i32 = arith.constant 0 : i32
    %c0_i32_0 = arith.constant 0 : i32
    %c0_i32_1 = arith.constant 0 : i32
    return %arg0, %c0_i32, %c0_i32_0 : i32, i32, i32
  }
  func.func @transform_1(%arg0: i32) -> (i32, i32, i32) {
    %c0_i32 = arith.constant 0 : i32
    %c0_i32_0 = arith.constant 0 : i32
    %c0_i32_1 = arith.constant 0 : i32
    return %arg0, %c0_i32, %c0_i32_0 : i32, i32, i32
  }
  func.func @transform_2(%arg0: i32) -> (i32, i32, i32) {
    %c0_i32 = arith.constant 0 : i32
    %c0_i32_0 = arith.constant 0 : i32
    %c0_i32_1 = arith.constant 0 : i32
    return %arg0, %c0_i32, %c0_i32_0 : i32, i32, i32
  }
  func.func @transform_3(%arg0: i32) -> (i32, i32) {
    %c0_i32 = arith.constant 0 : i32
    %c0_i32_0 = arith.constant 0 : i32
    %c0_i32_1 = arith.constant 0 : i32
    return %c0_i32, %c0_i32_0 : i32, i32
  }
  func.func @transform_4(%arg0: i32) -> (i32, i32) {
    %c0_i32 = arith.constant 0 : i32
    %c0_i32_0 = arith.constant 0 : i32
    %c0_i32_1 = arith.constant 0 : i32
    return %c0_i32, %c0_i32_0 : i32, i32
  }
  func.func @transform_5(%arg0: i32) -> (i32, i32) {
    %c0_i32 = arith.constant 0 : i32
    %c0_i32_0 = arith.constant 0 : i32
    %c0_i32_1 = arith.constant 0 : i32
    return %c0_i32, %c0_i32_0 : i32, i32
  }
  func.func @transform_6(%arg0: i32) -> (i32, i32) {
    %c0_i32 = arith.constant 0 : i32
    %c0_i32_0 = arith.constant 0 : i32
    %c0_i32_1 = arith.constant 0 : i32
    return %c0_i32, %c0_i32_0 : i32, i32
  }
  func.func @transform_7(%arg0: i32) -> (i32, i32, i32) {
    %c0_i32 = arith.constant 0 : i32
    %c0_i32_0 = arith.constant 0 : i32
    %c0_i32_1 = arith.constant 0 : i32
    return %arg0, %c0_i32, %c0_i32_0 : i32, i32, i32
  }
  func.func @transform_8(%arg0: i32) -> (i32, i32, i32, i32) {
    %c0_i32 = arith.constant 0 : i32
    %c0_i32_0 = arith.constant 0 : i32
    %c0_i32_1 = arith.constant 0 : i32
    %c0_i32_2 = arith.constant 0 : i32
    return %arg0, %c0_i32, %c0_i32_0, %c0_i32_1 : i32, i32, i32, i32
  }
}

</mosaic_0001>

<bundles_post_ra>
// kernel: tpu_custom_call.1
= control target key start
LH: loop header
LB: loop body
LE: loop exit
PB: predicated region body
PF: predicated region fallthrough
CT: control target
= control target key end

     0   :  { %s3740_s0 = inlined_call_operand.hbm [shape: f32[2,8,32], index: 0, kind: input, shape index: {}]   ;;  %s3741_s1 = inlined_call_operand.hbm [shape: f32[2,8,32], index: 1, kind: input, shape index: {}]   ;;  %s3742_s2 = inlined_call_operand.hbm [shape: f32[2,8,32], index: 2, kind: input, shape index: {}]   ;;  %s3743_s3 = inlined_call_operand.hbm [shape: f32[32,32], index: 3, kind: input, shape index: {}]   ;;  %s3744_s4 = inlined_call_operand.hbm [shape: f32[32,32], index: 4, kind: input, shape index: {}]   ;;  %s3745_s5 = inlined_call_operand.hbm [shape: f32[32,32], index: 5, kind: input, shape index: {}]   ;;  %s3746_s6 = inlined_call_operand.hbm [shape: f32[32,32], index: 6, kind: input, shape index: {}]   ;;  %s3747_s7 = inlined_call_operand.hbm [shape: f32[2,8,32], index: 7, kind: output, shape index: {0}]   ;;  %s3748_s8 = inlined_call_operand.hbm [shape: f32[2,8,8,8], index: 8, kind: output, shape index: {1}]  }
   0x1   :  { %3773 = sst [smem:[#allocation28_spill]] %s3741_s1 }
   0x2   :  { %3774 = sst [smem:[#allocation29_spill]] %s3743_s3 }
   0x3   :  { %3775 = sst [smem:[#allocation30_spill]] %s3745_s5 }
   0x4   :  { %3776 = sst [smem:[#allocation31_spill]] %s3747_s7 }
   0x5   :  { %3777 = sst [smem:[#allocation32_spill]] %s3748_s8 }
   0x6   :  { %14 = vsyncpa [#allocation3], 0 }
   0x7   :  { %16 = vsyncpa [#allocation3 + $0x1], 0 }
   0x8   :  { %17 = vsyncpa [#allocation6], 0 }
   0x9   :  { %19 = vsyncpa [#allocation6 + $0x1], 0 }
   0xa   :  { %20 = vsyncpa [#allocation9], 0 }
   0xb   :  { %21 = vsyncpa [#allocation12], 0 }
   0xc   :  { %22 = vsyncpa [#allocation4], 0 }
   0xd   :  { %24 = vsyncpa [#allocation4 + $0x1], 0 }
   0xe   :  { %25 = vsyncpa [#allocation16], 0 }
   0xf   :  { %27 = vsyncpa [#allocation16 + $0x1], 0  ;;  %s3173_s27 = smov 0   ;;  %s3175_s28 = smov 0  }
  0x10   :  { %s3177_s29 = smov 0   ;;  %s3179_s30 = smov 0  }
  0x11 LB: > { %3778 = sst [smem:[#allocation23_spill]] %s3085_s27  ;;  %s3099_s9 = smov [#allocation8]   ;;  %s3097_s30 = sphi %s3179_s30, %s3816_s30   ;;  %s3093_s29 = sphi %s3177_s29, %s3820_s29   ;;  %s3089_s28 = sphi %s3175_s28, %s3819_s28   ;;  %s3085_s27 = sphi %s3173_s27, %s3818_s27  }
  0x12   : > { %3779 = sst [smem:[#allocation24_spill]] %s3097_s30  ;;  %s264_s10 = sshll.u32 %s3099_s9, 4  ;;  %s3199_s10 = int_to_ptr.vmem [resolvable:$true] %s264_s10 }
  0x13   : > { %s3194_s11 = sadd.s32 4294967295, %s3097_s30   ;;  %p2366_p0 = scmp.ge.s32.totalorder %s3097_s30, 1 }
  0x14   : > { %p3759_p1 = scmp.eq.s32.totalorder %s3194_s11, 0  ;;  %p252_p2 = scmp.lt.s32.totalorder %s3097_s30, 3 }
  0x15   : > { %s3100_s13 = smov [#allocation11]   ;;  %s3782_s3 = sld [smem:[#allocation29_spill]] }
  0x16   : > { %p3201_p3 = pnand %p2366_p0, %p252_p2  ;;  %s290_s14 = sshll.u32 %s3100_s13, 4  ;;  %s3214_s14 = int_to_ptr.vmem [resolvable:$true] %s290_s14 }
  0x18   : > { %s3780_s12 = scalar_select %p3201_p3, 1, 0 }
  0x19   : > { %p2657_p5 = pneg %p3201_p3 }
  0x1b   : > { %p3210_p6 = pnand %p2657_p5, %p3759_p1  ;;  %s2785_s18 = scalar_lea.hbm %s3782_s3, 512 }
  0x1c   : > { %p2786_p7 = scmp.ne.s32.totalorder %s3782_s3, %s2785_s18  ;;  %p2792_p11 = scmp.lt.u32.totalorder %s2785_s18, %s3782_s3 }
  0x1d   : > { %s3781_s15 = scalar_select %p3210_p6, 1, 0 }
  0x1e   : > { %p3224_p8 = pneg %p3210_p6 }
  0x20   : > { %s3783_s21 = scalar_select %p3224_p8, 1, 0 }
  0x21   : > { %p2788_p9 = pnand %p3224_p8, %p2786_p7 }
  0x23   : > { %p2789_p10 = pneg %p2788_p9 }
  0x25   : > { %p2794_p12 = pnand %p2792_p11, %p2789_p10 }
  0x27   : > { %2797 = shalt.err (!%p2794_p12)
}
  0x28   : > { %s2798_s24 = scalar_lea.vmem %s3199_s10, 512  ;;  %p2806_p5 = scmp.lt.s32.totalorder %s3199_s10, %s3199_s10 }
  0x29   : > { %p2799_p13 = scmp.ne.s32.totalorder %s3199_s10, %s2798_s24  ;;  %p2807_p4 = scmp.lt.s32.totalorder %s2798_s24, %s2798_s24 }
  0x2b   : > { %p2801_p0 = pnand %p2799_p13, %p3224_p8  ;;  %p2808_p7 = por %p2807_p4, %p2806_p5 }
  0x2d   : > { %p2802_p2 = pneg %p2801_p0 }
  0x2f   : > { %p2809_p9 = pnand %p2808_p7, %p2802_p2 }
  0x31   : > { %2812 = shalt.err (!%p2809_p9)
}
  0x32   : > { %s3750_s25 = smov 128   ;;  %s3753_s26 = smov 8  }
  0x33   : > { %2660 = dma.hbm_to_vmem [thread:$0]  (!%p3210_p6), %s3782_s3, 512, %s3199_s10, [#allocation9], %s3750_s25, %s3750_s25, %s3753_s26  }
  0x34   : > { %s3784_s5 = sld [smem:[#allocation30_spill]] }
  0x3a   : > { %s2813_s18 = scalar_lea.hbm %s3784_s5, 512 }
  0x3b   : > { %p2814_p4 = scmp.ne.s32.totalorder %s3784_s5, %s2813_s18  ;;  %p2820_p12 = scmp.lt.u32.totalorder %s2813_s18, %s3784_s5 }
  0x3d   : > { %p2816_p10 = pnand %p2814_p4, %p3224_p8 }
  0x3f   : > { %p2817_p11 = pneg %p2816_p10 }
  0x41   : > { %p2822_p13 = pnand %p2820_p12, %p2817_p11 }
  0x43   : > { %2825 = shalt.err (!%p2822_p13)
}
  0x44   : > { %s2826_s10 = scalar_lea.vmem %s3214_s14, 512  ;;  %p2834_p7 = scmp.lt.s32.totalorder %s3214_s14, %s3214_s14 }
  0x45   : > { %p2827_p0 = scmp.ne.s32.totalorder %s3214_s14, %s2826_s10  ;;  %p2835_p9 = scmp.lt.s32.totalorder %s2826_s10, %s2826_s10 }
  0x47   : > { %p2829_p2 = pnand %p2827_p0, %p3224_p8  ;;  %p2836_p4 = por %p2835_p9, %p2834_p7 }
  0x49   : > { %p2830_p5 = pneg %p2829_p2 }
  0x4b   : > { %p2837_p10 = pnand %p2836_p4, %p2830_p5 }
  0x4d   : > { %2840 = shalt.err (!%p2837_p10)
}
  0x4e   : > { %2666 = dma.hbm_to_vmem [thread:$0]  (!%p3210_p6), %s3784_s5, 512, %s3214_s14, [#allocation12], %s3750_s25, %s3750_s25, %s3753_s26  }
  0x4f   : > { %s2365_s13 = sadd.s32 4294967294, %s3097_s30   ;;  %s3276_s16 = sadd.s32 1, %s3097_s30  }
  0x50   : > { %3785 = sst [smem:[#allocation25_spill]] %s3276_s16  ;;  %s37_s17 = ssub.s32 %s3097_s30, %s3276_s16 }
  0x51   : > { %s40_s18 = sadd.s32 1, %s3093_s29  ;;  %p38_p11 = scmp.eq.s32.totalorder %s37_s17, 0 }
  0x52   : > { %p47_p12 = scmp.ne.s32.totalorder %s3093_s29, %s3089_s28  ;;  %p48_p13 = scmp.eq.s32.totalorder %s3097_s30, 0 }
  0x53   : > { %p53_p0 = scmp.ne.s32.totalorder %s3089_s28, %s3085_s27  ;;  %p213_p7 = scmp.eq.s32.totalorder %s3194_s11, 1 }
  0x54   : > { %s3287_s19 = scalar_select %p38_p11, %s3093_s29, %s40_s18  }
  0x55   : > { %p49_p2 = por %p48_p13, %p47_p12  ;;  %p3291_p5 = por %p3759_p1, %p53_p0 }
  0x56   : > { %3786 = sst [smem:[#allocation26_spill]] %s3287_s19  ;;  %p219_p9 = scmp.eq.s32.totalorder %s2365_s13, 1 }
  0x57   : > { %s3787_s20 = scalar_select %p3291_p5, 1, 0 }
  0x58   : > { %p2691_p4 = scmp.lt.s32.totalorder %s3097_s30, 2  ;;  %s3752_s14 = sand.u32 1, %s3093_s29  }
  0x59   : > { %p3298_p10 = por %p213_p7, %p47_p12  ;;  %p3302_p3 = por %p219_p9, %p53_p0 }
  0x5a   : > { %s3308_s10 = sshll.u32 %s3752_s14, 3  ;;  %s3311_s24 = sshll.u32 %s3097_s30, 7 }
  0x5b   : > { %s3788_s22 = scalar_select %p3298_p10, 1, 0 }
  0x5c   : > { %s3789_s23 = scalar_select %p3302_p3, 1, 0 }
  0x5d   : > { %p3313_p11 = pnand %p2691_p4, %p49_p2  ;;  %s335_s13 = sand.u32 1, %s3097_s30  }
  0x5e   : > { %3790 = sst [smem:[#allocation27_spill]] %s3789_s23  ;;  %s3792_s1 = sld [smem:[#allocation28_spill]] }
  0x5f   : > { %s3791_s9 = scalar_select %p3313_p11, 1, 0 }
  0x60   : > { %s339_s14 = scalar_lea.vmem [#allocation5], %s3308_s10  ;;  %s3103_s3 = smov [#allocation10]  }
  0x61   : > { %s346_s26 = sshll.u32 %s339_s14, 4  ;;  %s3327_s5 = sshll.u32 %s3103_s3, 4  ;;  %s3325_s26 = int_to_ptr.vmem [resolvable:$true] %s346_s26  ;;  %s278_s5 = int_to_ptr.vmem [resolvable:$true] %s3327_s5 }
  0x62   : > { %s3329_s19 = scalar_lea.sflag [#allocation6], %s335_s13  ;;  %p3335_p13 = pneg %p3313_p11 }
  0x64   : > { %s3322_s25 = scalar_lea.hbm %s3792_s1, %s3311_s24  ;;  %s2846_s30 = scalar_lea.hbm %s3792_s1, 256 }
  0x65   : > { %s2841_s16 = scalar_lea.hbm %s3322_s25, 128  ;;  %p2847_p7 = scmp.lt.u32.totalorder %s3322_s25, %s3792_s1 }
  0x66   : > { %p2842_p12 = scmp.ne.s32.totalorder %s3322_s25, %s2841_s16  ;;  %p2848_p9 = scmp.lt.u32.totalorder %s2846_s30, %s2841_s16 }
  0x67   : > { %s3793_s17 = scalar_select %p3335_p13, 1, 0 }
  0x68   : > { %p2844_p0 = pnand %p3335_p13, %p2842_p12  ;;  %p2849_p4 = por %p2848_p9, %p2847_p7 }
  0x69   : > { %p2850_p1 = scmp.lt.u32.totalorder %s2841_s16, %s3322_s25 }
  0x6a   : > { %p2845_p2 = pneg %p2844_p0 }
  0x6b   : > { %p2851_p3 = por %p2850_p1, %p2849_p4 }
  0x6d   : > { %p2852_p10 = pnand %p2851_p3, %p2845_p2 }
  0x6f   : > { %2855 = shalt.err (!%p2852_p10)
}
  0x70   : > { %s2856_s13 = scalar_lea.vmem %s3325_s26, 128  ;;  %s3104_s18 = smov [#allocation5]  }
  0x71   : > { %p2857_p12 = scmp.ne.s32.totalorder %s3325_s26, %s2856_s13  ;;  %s2861_s14 = sshll.u32 %s3104_s18, 4  ;;  %s2862_s14 = int_to_ptr.vmem [resolvable:$false] %s2861_s14 }
  0x72   : > { %s2863_s23 = scalar_lea.vmem %s2862_s14, 256  ;;  %p2864_p6 = scmp.lt.s32.totalorder %s3325_s26, %s2862_s14 }
  0x73   : > { %p2859_p0 = pnand %p2857_p12, %p3335_p13  ;;  %p2865_p8 = scmp.lt.s32.totalorder %s2863_s23, %s2856_s13 }
  0x75   : > { %p2860_p5 = pneg %p2859_p0  ;;  %p2866_p7 = por %p2865_p8, %p2864_p6 }
  0x77   : > { %p2867_p9 = pnand %p2866_p7, %p2860_p5 }
  0x79   : > { %2870 = shalt.err (!%p2867_p9)
}
  0x7a   : > { %2676 = dma.hbm_to_vmem [thread:$0]  (!%p3313_p11), %s3322_s25, 128, %s3325_s26, %s3329_s19  }
  0x7b   : > { %s2871_s3 = scalar_lea.hbm %s3744_s4, 512  ;;  %p3794_p3 = scmp.ne.s32.totalorder %s3783_s21, 0 }
  0x7c   : > { %p2872_p1 = scmp.ne.s32.totalorder %s3744_s4, %s2871_s3  ;;  %p2878_p5 = scmp.lt.u32.totalorder %s2871_s3, %s3744_s4 }
  0x7e   : > { %p2874_p6 = pnand %p2872_p1, %p3794_p3 }
  0x80   : > { %p2875_p8 = pneg %p2874_p6 }
  0x82   : > { %p2880_p10 = pnand %p2878_p5, %p2875_p8 }
  0x84   : > { %2883 = shalt.err (!%p2880_p10)
}
  0x85   : > { %s2884_s23 = scalar_lea.vmem %s278_s5, 512  ;;  %p2892_p0 = scmp.lt.s32.totalorder %s278_s5, %s278_s5 }
  0x86   : > { %p2885_p2 = scmp.ne.s32.totalorder %s278_s5, %s2884_s23  ;;  %p2893_p7 = scmp.lt.s32.totalorder %s2884_s23, %s2884_s23 }
  0x88   : > { %p2887_p4 = pnand %p2885_p2, %p3794_p3  ;;  %p2894_p9 = por %p2893_p7, %p2892_p0 }
  0x8a   : > { %p2888_p12 = pneg %p2887_p4 }
  0x8c   : > { %p2895_p11 = pnand %p2894_p9, %p2888_p12 }
  0x8e   : > { %2898 = shalt.err (!%p2895_p11)
}
  0x8f   : > { %p3795_p1 = scmp.ne.s32.totalorder %s3781_s15, 0  ;;  %s3796_s1 = smov 8  }
  0x90   : > { %s3797_s25 = smov 128   ;;  %s3105_s16 = smov [#allocation13]  }
  0x91   : > { %2663 = dma.hbm_to_vmem [thread:$0]  (!%p3795_p1), %s3744_s4, 512, %s278_s5, [#allocation9], %s3797_s25, %s3797_s25, %s3796_s1  }
  0x92   : > { %s303_s3 = sshll.u32 %s3105_s16, 4  ;;  %s2899_s14 = scalar_lea.hbm %s3746_s6, 512  ;;  %s304_s3 = int_to_ptr.vmem [resolvable:$true] %s303_s3 }
  0x93   : > { %p2900_p11 = scmp.ne.s32.totalorder %s3746_s6, %s2899_s14  ;;  %p2906_p5 = scmp.lt.u32.totalorder %s2899_s14, %s3746_s6 }
  0x95   : > { %p2902_p6 = pnand %p2900_p11, %p3794_p3 }
  0x97   : > { %p2903_p8 = pneg %p2902_p6 }
  0x99   : > { %p2908_p10 = pnand %p2906_p5, %p2903_p8 }
  0x9b   : > { %2911 = shalt.err (!%p2908_p10)
}
  0x9c   : > { %s2912_s5 = scalar_lea.vmem %s304_s3, 512  ;;  %p2920_p0 = scmp.lt.s32.totalorder %s304_s3, %s304_s3 }
  0x9d   : > { %p2913_p2 = scmp.ne.s32.totalorder %s304_s3, %s2912_s5  ;;  %p2921_p7 = scmp.lt.s32.totalorder %s2912_s5, %s2912_s5 }
  0x9f   : > { %p2915_p4 = pnand %p2913_p2, %p3794_p3  ;;  %p2922_p9 = por %p2921_p7, %p2920_p0 }
  0xa1   : > { %p2916_p12 = pneg %p2915_p4 }
  0xa3   : > { %p2923_p13 = pnand %p2922_p9, %p2916_p12 }
  0xa5   : > { %2926 = shalt.err (!%p2923_p13)
}
  0xa6   : > { %2669 = dma.hbm_to_vmem [thread:$0]  (!%p3795_p1), %s3746_s6, 512, %s304_s3, [#allocation12], %s3797_s25, %s3797_s25, %s3796_s1  }
  0xa7   : > { %s3406_s26 = scalar_lea.hbm %s3740_s0, %s3311_s24  ;;  %s321_s15 = scalar_lea.vmem [#allocation2], %s3308_s10 }
  0xa8   : > { %s328_s30 = sshll.u32 %s321_s15, 4  ;;  %s3798_s16 = sand.u32 1, %s3093_s29   ;;  %s329_s30 = int_to_ptr.vmem [resolvable:$true] %s328_s30 }
  0xa9   : > { %s318_s18 = scalar_lea.sflag [#allocation3], %s3798_s16  ;;  %s2927_s13 = scalar_lea.hbm %s3406_s26, 128 }
  0xaa   : > { %p2928_p13 = scmp.ne.s32.totalorder %s3406_s26, %s2927_s13  ;;  %p3799_p3 = scmp.ne.s32.totalorder %s3793_s17, 0 }
  0xab   : > { %s2932_s3 = scalar_lea.hbm %s3740_s0, 256  ;;  %p2933_p1 = scmp.lt.u32.totalorder %s3406_s26, %s3740_s0 }
  0xac   : > { %p2930_p11 = pnand %p2928_p13, %p3799_p3  ;;  %p2934_p8 = scmp.lt.u32.totalorder %s2932_s3, %s2927_s13 }
  0xad   : > { %p2936_p10 = scmp.lt.u32.totalorder %s2927_s13, %s3406_s26 }
  0xae   : > { %p2931_p6 = pneg %p2930_p11  ;;  %p2935_p5 = por %p2934_p8, %p2933_p1 }
  0xb0   : > { %p2937_p2 = por %p2936_p10, %p2935_p5 }
  0xb2   : > { %p2938_p4 = pnand %p2937_p2, %p2931_p6 }
  0xb4   : > { %2941 = shalt.err (!%p2938_p4)
}
  0xb5   : > { %s2942_s5 = scalar_lea.vmem %s329_s30, 128  ;;  %s3106_s7 = smov [#allocation2]  }
  0xb6   : > { %p2943_p12 = scmp.ne.s32.totalorder %s329_s30, %s2942_s5  ;;  %s2947_s8 = sshll.u32 %s3106_s7, 4  ;;  %s2948_s8 = int_to_ptr.vmem [resolvable:$false] %s2947_s8 }
  0xb7   : > { %s2949_s27 = scalar_lea.vmem %s2948_s8, 256  ;;  %p2950_p9 = scmp.lt.s32.totalorder %s329_s30, %s2948_s8 }
  0xb8   : > { %p2945_p0 = pnand %p2943_p12, %p3799_p3  ;;  %p2951_p13 = scmp.lt.s32.totalorder %s2949_s27, %s2942_s5 }
  0xba   : > { %p2946_p7 = pneg %p2945_p0  ;;  %p2952_p11 = por %p2951_p13, %p2950_p9 }
  0xbc   : > { %p2953_p1 = pnand %p2952_p11, %p2946_p7 }
  0xbe   : > { %2956 = shalt.err (!%p2953_p1)
}
  0xbf   : > { %p3800_p8 = scmp.ne.s32.totalorder %s3791_s9, 0  ;;  %s3432_s16 = scalar_lea.hbm %s3742_s2, %s3311_s24 }
  0xc0   : > { %s357_s13 = scalar_lea.vmem [#allocation7], %s3308_s10  ;;  %s2957_s25 = scalar_lea.hbm %s3432_s16, 128 }
  0xc1   : > { %2673 = dma.hbm_to_vmem [thread:$0]  (!%p3800_p8), %s3406_s26, 128, %s329_s30, %s318_s18  }
  0xc2   : > { %s364_s1 = sshll.u32 %s357_s13, 4  ;;  %p2958_p6 = scmp.ne.s32.totalorder %s3432_s16, %s2957_s25  ;;  %s365_s1 = int_to_ptr.vmem [resolvable:$true] %s364_s1 }
  0xc3   : > { %s2962_s26 = scalar_lea.hbm %s3742_s2, 256  ;;  %p2963_p2 = scmp.lt.u32.totalorder %s3432_s16, %s3742_s2 }
  0xc4   : > { %p2960_p5 = pnand %p2958_p6, %p3799_p3  ;;  %p2964_p4 = scmp.lt.u32.totalorder %s2962_s26, %s2957_s25 }
  0xc5   : > { %p2966_p0 = scmp.lt.u32.totalorder %s2957_s25, %s3432_s16 }
  0xc6   : > { %p2961_p10 = pneg %p2960_p5  ;;  %p2965_p12 = por %p2964_p4, %p2963_p2 }
  0xc8   : > { %p2967_p7 = por %p2966_p0, %p2965_p12 }
  0xca   : > { %p2968_p9 = pnand %p2967_p7, %p2961_p10 }
  0xcc   : > { %2971 = shalt.err (!%p2968_p9)
}
  0xcd   : > { %s2972_s10 = scalar_lea.vmem %s365_s1, 128  ;;  %s3107_s24 = smov [#allocation7]  }
  0xce   : > { %p2973_p13 = scmp.ne.s32.totalorder %s365_s1, %s2972_s10  ;;  %s2977_s23 = sshll.u32 %s3107_s24, 4  ;;  %s2978_s23 = int_to_ptr.vmem [resolvable:$false] %s2977_s23 }
  0xcf   : > { %s2979_s5 = scalar_lea.vmem %s2978_s23, 256  ;;  %p2980_p6 = scmp.lt.s32.totalorder %s365_s1, %s2978_s23 }
  0xd0   : > { %p2975_p11 = pnand %p2973_p13, %p3799_p3  ;;  %p2981_p5 = scmp.lt.s32.totalorder %s2979_s5, %s2972_s10 }
  0xd2   : > { %p2976_p1 = pneg %p2975_p11  ;;  %p2982_p8 = por %p2981_p5, %p2980_p6 }
  0xd4   : > { %p2983_p2 = pnand %p2982_p8, %p2976_p1 }
  0xd6   : > { %2986 = shalt.err (!%p2983_p2)
}
  0xd7   : > { %p3801_p4 = scmp.ne.s32.totalorder %s3791_s9, 0  ;;  %p3802_p10 = scmp.ne.s32.totalorder %s3780_s12, 0 }
  0xd8   : > { %s3456_s17 = sand.u32 (!%p3802_p10), 1, %s3089_s28   ;;  %p3803_p3 = scmp.ne.s32.totalorder (!%p3802_p10), %s3787_s20, 0 }
  0xd9   : > { %2679 = dma.hbm_to_vmem [thread:$0]  (!%p3801_p4), %s3432_s16, 128, %s365_s1, %s3329_s19  }
  0xda   : > { %373 = sbr.rel (%p3802_p10) target bundleno = 2157 (0x86d), region = 48  ;;  %s3459_s7 = sshll.u32 (!%p3802_p10), %s3456_s17, 3 }
  0xdb   : > { %s376_s8 = scalar_lea.sflag (!%p3802_p10), [#allocation3], %s3456_s17  ;;  %s379_s27 = scalar_lea.vmem (!%p3802_p10), [#allocation2], %s3459_s7 }
  0xe1   : > { %3060 = dma.done.wait (%p3803_p3), %s376_s8, 128  }
  0xe2   : > { %3062 = vsyncadd (%p3803_p3), %s376_s8, 4294967168  ;;  %s384_s12 = sand.u32 1, %s3194_s11   ;;  %s388_s9 = scalar_lea.vmem [#allocation5], %s3459_s7 }
  0xe3   : > { %s385_s19 = scalar_lea.sflag [#allocation6], %s384_s12 }
  0xe4   : > { %3064 = dma.done.wait (%p3803_p3), %s385_s19, 256  }
  0xe5   : > { %3066 = vsyncadd (%p3803_p3), %s385_s19, 4294967040  ;;  %s397_s21 = scalar_lea.vmem [#allocation7], %s3459_s7  ;;  %p3804_p8 = scmp.eq.s32.totalorder %s3194_s11, 0 }
  0xe7   : > { %3068 = dma.done.wait (%p3804_p8), [#allocation9], 1024   ;;  %p3805_p12 = pmov %p3804_p8 }
  0xe8   : > { %p3806_p0 = pmov %p3804_p8 }
  0xe9   : > { %3070 = vsyncadd (%p3805_p12), [#allocation9], 4294966272 }
  0xea   : > { %3072 = dma.done.wait (%p3806_p0), [#allocation12], 1024   ;;  %p3807_p7 = pmov %p3806_p0 }
  0xeb   : > { %v3108_v0 = vmov 0.0|0.0   ;;  %vm3109_vm0 = vmmov 0   ;;  %v3110_v1 = vmov 0.0   ;;  %v542_v2 = vld [vmem:[#allocation10] sm:$0xff]  ;;  %v543_v3 = vld [vmem:[#allocation10 + $0x8] sm:$0xff]  ;;  %v544_v7 = vld [vmem:[#allocation10 + $0x10] sm:$0xff] }
  0xec   : > { %3074 = vsyncadd (%p3807_p7), [#allocation12], 4294966272  ;;  %2613 = vmatprep.subr.bf16.mxu1 %v3108_v0  ;;  %2607 = vmatprep.subr.bf16.mxu0 %v3108_v0  ;;  %v464_v4 = vld [vmem:[#allocation8] sm:$0xff]  ;;  %v2614_v5 = vpack.c.bf16 %v543_v3, %v542_v2  ;;  %v465_v6 = vld [vmem:[#allocation8 + $0x8] sm:$0xff]  ;;  %vm468_vm1 = vcmask 261120   ;;  %vm696_vm2 = vcmask 31744  }
  0xed   : > { %2502 = vmatprep.mubr.msk.f32.mxu1 %vm3109_vm0, %v3110_v1  ;;  %2491 = vmatprep.mubr.msk.f32.mxu0 %vm3109_vm0, %v3110_v1  ;;  %v545_v8 = vld [vmem:[#allocation10 + $0x18] sm:$0xff]  ;;  %v2608_v9 = vpack.c.bf16 %v465_v6, %v464_v4  ;;  %v466_v10 = vld [vmem:[#allocation8 + $0x10] sm:$0xff]  ;;  %v462_v14 = vld [vmem:[%s388_s9] sm:$0xff]  ;;  %s3111_s20 = smov 124   ;;  %s3112_s15 = smov 120   ;;  %vm773_vm3 = vcmask 64512  }
  0xee   : > { %v467_v11 = vld [vmem:[#allocation8 + $0x18] sm:$0xff]  ;;  %2615 = vmatpush3.bf16.msra.mxu1 %v2614_v5  ;;  %v2617_v12 = vpack.c.bf16 %v545_v8, %v544_v7  ;;  %s3113_s16 = smov 116   ;;  %s3114_s13 = smov 112   ;;  %v619_v20 = vld [vmem:[#allocation11] sm:$0xff]  ;;  %v620_v21 = vld [vmem:[#allocation11 + $0x8] sm:$0xff]  ;;  %vm2059_vm4 = vcmask 97280  }
  0xef   : > { %2609 = vmatpush3.bf16.msra.mxu0 %v2608_v9  ;;  %2616 = vmatprep.subr.bf16.mxu1 %v3108_v0  ;;  %v2611_v13 = vpack.c.bf16 %v467_v11, %v466_v10  ;;  %v461_v15 = vld [vmem:[%s379_s27] sm:$0xff]  ;;  %s3115_s1 = smov 108   ;;  %s3116_s25 = smov 104   ;;  %v2620_v23 = vpack.c.bf16 %v620_v21, %v619_v20  ;;  %vm2061_vm5 = vcmask 130048   ;;  %vm2063_vm6 = vcmask 162816  }
  0xf0   : > { %2610 = vmatprep.subr.bf16.mxu0 %v3108_v0  ;;  %s3117_s3 = smov 100   ;;  %v621_v22 = vld [vmem:[#allocation11 + $0x10] sm:$0xff]  ;;  %v622_v24 = vld [vmem:[#allocation11 + $0x18] sm:$0xff]  ;;  %s2387_s14 = sshll.u32 %s3456_s17, 6  ;;  %vm2065_vm7 = vcmask 195584   ;;  %vm2067_vm8 = vcmask 228352  }
  0xf1   : > { %v2623_v25 = vpack.c.bf16 %v622_v24, %v621_v22  ;;  %v463_v26 = vld [vmem:[%s397_s21] sm:$0xff]  ;;  %s3546_s26 = scalar_lea.vmem [#allocation15], %s2387_s14  ;;  %s3118_s30 = smov 4  }
  0xf2   : > { %2618 = vmatpush3.bf16.msra.mxu1 %v2617_v12  ;;  %s3119_s18 = smov 8   ;;  %s3120_s10 = smov 12  }
  0xf3   : > { %2612 = vmatpush3.bf16.msra.mxu0 %v2611_v13  ;;  %2516 = vmatprep.subr.mxu1 %v3110_v1  ;;  %s3121_s24 = smov 16   ;;  %s3122_s23 = smov 20  }
  0xf4   : > { %2619 = vmatprep.subr.bf16.mxu0 %v3108_v0  ;;  %s3123_s5 = smov 24   ;;  %s3124_s8 = smov 28  }
  0xf5   : > { %2503 = vmatmul.mubr.msk.f32.vlgmr.msra.gmra.mrb[0].mxu1 %vm468_vm1, %v462_v14  ;;  %s2430_s27 = sshll.u32 %s3194_s11, 10  ;;  %s2179_s12 = sshll.u32 %s3546_s26, 4  ;;  %s3663_s12 = int_to_ptr.vmem [resolvable:$true] %s2179_s12 }
  0xf6   : > { %2492 = vmatmul.mubr.msk.f32.vlgmr.msra.gmra.mrb[0].mxu0 %vm468_vm1, %v461_v15  ;;  %2518 = vmatprep.mubr.msk.f32.mxu1 %vm3109_vm0, %v3110_v1  ;;  %s3808_s21 = sld [smem:[#allocation32_spill]]  ;;  %p3809_p13 = scmp.ne.s32.totalorder %s3788_s22, 0 }
  0xf7   : > { %2513 = vmatprep.mubr.msk.f32.mxu0 %vm3109_vm0, %v3110_v1  ;;  %2621 = vmatpush3.bf16.msra.mxu0 %v2620_v23 }
  0xf8   : > { %2622 = vmatprep.subr.bf16.mxu0 %v3108_v0 }
  0xfb   : > { %2624 = vmatpush3.bf16.msra.mxu0 %v2623_v25 }
  0xfc   : > { %2536 = vmatprep.subr.mxu0 %v3110_v1 }
  0xfe   : > { %2514 = vmatmul.mubr.msk.f32.vlgmr.msra.gmra.mrb[2].mxu0 %vm468_vm1, %v463_v26 }
  0xff   : > { %2538 = vmatprep.mubr.msk.f32.mxu0 %vm3109_vm0, %v3110_v1 }
 0x1c8   : > { %v615_v16 = vpop.f32.mrb[0].mxu1 }
 0x1c9   : > { %861 = vrot.lane.b32.xlu1 %v615_v16, %s3111_s20  ;;  %v2504_v17 = vpop.f32.mrb[1].mxu1  ;;  %2517 = vmatpush3.xpose.msk.msra.mxu1 %vm696_vm2, %v615_v16  ;;  %v538_v18 = vpop.f32.mrb[0].mxu0 }
 0x1ca   : > { %v2493_v19 = vpop.f32.mrb[1].mxu0  ;;  %2521 = vmatprep.subr.mxu1 %v3110_v1 }
 0x1cc   : > { %2519 = vmatmul.mubr.msk.f32.vlgmr.msra.gmra.mrb[2].mxu1 %vm696_vm2, %v538_v18 }
 0x1cd   : > { %859 = vrot.lane.b32.xlu1 %v538_v18, %s3111_s20  ;;  %2523 = vmatprep.mubr.msk.f32.mxu1 %vm3109_vm0, %v3110_v1 }
 0x1d1   : > { %1027 = vrot.lane.b32.xlu1 %v538_v18, %s3112_s15  ;;  %v3526_v35 = vpop.f32.mrb[2].mxu0 }
 0x1d2   : > { %2522 = vmatpush3.msra.mxu1 %v3526_v35  ;;  %v2515_v36 = vpop.f32.mrb[3].mxu0 }
 0x1d3   : > { %2526 = vmatprep.subr.mxu1 %v3110_v1 }
 0x1d5   : > { %1196 = vrot.lane.b32.xlu1 %v615_v16, %s3113_s16 }
 0x1d9   : > { %1194 = vrot.lane.b32.xlu1 %v538_v18, %s3113_s16 }
 0x1dd   : > { %1363 = vrot.lane.b32.xlu1 %v615_v16, %s3114_s13 }
 0x1e1   : > { %1361 = vrot.lane.b32.xlu1 %v538_v18, %s3114_s13 }
 0x1e5   : > { %1530 = vrot.lane.b32.xlu1 %v615_v16, %s3115_s1 }
 0x1e9   : > { %1697 = vrot.lane.b32.xlu1 %v615_v16, %s3116_s25 }
 0x1ed   : > { %1864 = vrot.lane.b32.xlu1 %v615_v16, %s3117_s3 }
 0x23b   : > { %v862_v37 = vpop.permute.xlu1 %861 }
 0x23f   : > { %v860_v38 = vpop.permute.xlu1 %859 }
 0x243   : > { %v1028_v39 = vpop.permute.xlu1 %1027 }
 0x247   : > { %v1197_v40 = vpop.permute.xlu1 %1196 }
 0x24b   : > { %v1195_v41 = vpop.permute.xlu1 %1194 }
 0x24f   : > { %v1364_v42 = vpop.permute.xlu1 %1363 }
 0x253   : > { %v1362_v45 = vpop.permute.xlu1 %1361 }
 0x257   : > { %v1531_v47 = vpop.permute.xlu1 %1530 }
 0x25b   : > { %v1698_v50 = vpop.permute.xlu1 %1697 }
 0x25f   : > { %v1865_v52 = vpop.permute.xlu1 %1864 }
 0x29f   : > { %v769_v27 = vpop.f32.mrb[2].mxu1 }
 0x2a0   : > { %v2520_v28 = vpop.f32.mrb[3].mxu1  ;;  %v774_v29 = vsel %vm773_vm3, %v769_v27, -inf }
 0x2a1   : > { %775 = vmax.xlane.f32.xlu0 %v774_v29 }
 0x32e   : > { %v776_v30 = vpop.xlane.xlu0 %775 }
 0x32f   : > { %v777_v31 = vsub.f32 %v769_v27, %v776_v30 }
 0x331   : > { %v778_v32 = vmul.f32 1.442695, %v777_v31 }
 0x333   : > { %2753 = vpow2.f32 %v778_v32 }
 0x33d   : > { %v2754_v33 = vpop.eup %2753 }
 0x33e   : > { %v780_v34 = vsel %vm773_vm3, %v2754_v33, 0.0 }
 0x33f   : > { %781 = vadd.xlane.f32.xlu0 %v780_v34 }
 0x355   : > { %1029 = vrot.lane.b32.xlu0 %v615_v16, %s3112_s15 }
 0x359   : > { %1528 = vrot.lane.b32.xlu0 %v538_v18, %s3115_s1 }
 0x35d   : > { %1695 = vrot.lane.b32.xlu0 %v538_v18, %s3116_s25 }
 0x361   : > { %1862 = vrot.lane.b32.xlu0 %v538_v18, %s3117_s3 }
 0x3cc   : > { %v782_v43 = vpop.xlane.xlu0 %781 }
 0x3cd   : > { %2755 = vrcp.f32 %v782_v43 }
 0x3d0   : > { %v1030_v44 = vpop.permute.xlu0 %1029 }
 0x3d1   : > { %2537 = vmatpush3.xpose.msk.msra.mxu0 %vm696_vm2, %v1030_v44 }
 0x3d2   : > { %2546 = vmatprep.subr.mxu0 %v3110_v1 }
 0x3d4   : > { %2539 = vmatmul.mubr.msk.f32.vlgmr.msra.gmra.mrb[4].mxu0 %vm696_vm2, %v1028_v39  ;;  %v1529_v49 = vpop.permute.xlu0 %1528 }
 0x3d5   : > { %2547 = vmatpush3.xpose.msk.msra.mxu0 %vm696_vm2, %v1197_v40  ;;  %2548 = vmatprep.mubr.msk.f32.mxu0 %vm3109_vm0, %v3110_v1 }
 0x3d6   : > { %2556 = vmatprep.subr.mxu0 %v3110_v1 }
 0x3d7   : > { %v2756_v46 = vpop.eup %2755 }
 0x3d8   : > { %v784_v48 = vmul.f32 %v2756_v46, %v2754_v33  ;;  %2549 = vmatmul.mubr.msk.f32.vlgmr.msra.gmra.mrb[6].mxu0 %vm696_vm2, %v1195_v41  ;;  %v1696_v51 = vpop.permute.xlu0 %1695 }
 0x3d9   : > { %2557 = vmatpush3.xpose.msk.msra.mxu0 %vm696_vm2, %v1364_v42  ;;  %2558 = vmatprep.mubr.msk.f32.mxu0 %vm3109_vm0, %v3110_v1 }
 0x3da   : > { %785 = vst.msk [vmem:[%s3546_s26] sm:$0xff] %vm773_vm3, %v784_v48  ;;  %2524 = vmatmul.mubr.msk.f32.vlgmr.msra.gmra.mrb[4].mxu1 %vm773_vm3, %v784_v48  ;;  %2566 = vmatprep.subr.mxu0 %v3110_v1 }
 0x3db   : > { %2527 = vmatpush3.xpose.msk.msra.mxu1 %vm696_vm2, %v862_v37  ;;  %2528 = vmatprep.mubr.msk.f32.mxu1 %vm3109_vm0, %v3110_v1 }
 0x3dc   : > { %2559 = vmatmul.mubr.msk.f32.vlgmr.msra.gmra.mrb[8].mxu0 %vm696_vm2, %v1362_v45  ;;  %2531 = vmatprep.subr.mxu1 %v3110_v1  ;;  %v1863_v53 = vpop.permute.xlu0 %1862 }
 0x3dd   : > { %2567 = vmatpush3.xpose.msk.msra.mxu0 %vm696_vm2, %v1531_v47  ;;  %2568 = vmatprep.mubr.msk.f32.mxu0 %vm3109_vm0, %v3110_v1 }
 0x3de   : > { %2529 = vmatmul.mubr.msk.f32.vlgmr.msra.gmra.mrb[6].mxu1 %vm696_vm2, %v860_v38  ;;  %2576 = vmatprep.subr.mxu0 %v3110_v1 }
 0x3df   : > { %2533 = vmatprep.mubr.msk.f32.mxu1 %vm3109_vm0, %v3110_v1 }
 0x3e0   : > { %2569 = vmatmul.mubr.msk.f32.vlgmr.msra.gmra.mrb[10].mxu0 %vm696_vm2, %v1529_v49 }
 0x3e1   : > { %2577 = vmatpush3.xpose.msk.msra.mxu0 %vm696_vm2, %v1698_v50  ;;  %2578 = vmatprep.mubr.msk.f32.mxu0 %vm3109_vm0, %v3110_v1 }
 0x3e2   : > { %2586 = vmatprep.subr.mxu0 %v3110_v1 }
 0x3e4   : > { %2579 = vmatmul.mubr.msk.f32.vlgmr.msra.gmra.mrb[12].mxu0 %vm696_vm2, %v1696_v51 }
 0x3e5   : > { %2587 = vmatpush3.xpose.msk.msra.mxu0 %vm696_vm2, %v1865_v52  ;;  %2588 = vmatprep.mubr.msk.f32.mxu0 %vm3109_vm0, %v3110_v1 }
 0x3e6   : > { %2625 = vmatprep.subr.bf16.mxu0 %v3108_v0 }
 0x3e8   : > { %2589 = vmatmul.mubr.msk.f32.vlgmr.msra.gmra.mrb[14].mxu0 %vm696_vm2, %v1863_v53 }
 0x3e9   : > { %2604 = vmatprep.mubr.msk.f32.mxu0 %vm3109_vm0, %v3110_v1 }
 0x4a7   : > { %v1101_v54 = vpop.f32.mrb[4].mxu0 }
 0x4a8   : > { %v2540_v55 = vpop.f32.mrb[5].mxu0  ;;  %v1105_v56 = vsel %vm773_vm3, %v1101_v54, -inf }
 0x4a9   : > { %1106 = vmax.xlane.f32.xlu0 %v1105_v56 }
 0x4ab   : > { %v1268_v57 = vpop.f32.mrb[6].mxu0 }
 0x4ac   : > { %v2550_v58 = vpop.f32.mrb[7].mxu0  ;;  %v1272_v59 = vsel %vm773_vm3, %v1268_v57, -inf }
 0x4ad   : > { %v3579_v60 = vpop.f32.mrb[4].mxu1  ;;  %1273 = vmax.xlane.f32.xlu0 %v1272_v59 }
 0x4ae   : > { %v2525_v61 = vpop.f32.mrb[5].mxu1 }
 0x4af   : > { %v1435_v62 = vpop.f32.mrb[8].mxu0 }
 0x4b0   : > { %v2560_v63 = vpop.f32.mrb[9].mxu0  ;;  %v1439_v8 = vsel %vm773_vm3, %v1435_v62, -inf }
 0x4b1   : > { %v3581_v2 = vpop.f32.mrb[6].mxu1 }
 0x4b2   : > { %v2530_v3 = vpop.f32.mrb[7].mxu1  ;;  %v937_v4 = vsel %vm773_vm3, %v3581_v2, -inf }
 0x4b3   : > { %938 = vmax.xlane.f32.xlu1 %v937_v4  ;;  %v1602_v5 = vpop.f32.mrb[10].mxu0 }
 0x4b4   : > { %v2570_v6 = vpop.f32.mrb[11].mxu0  ;;  %v1606_v7 = vsel %vm773_vm3, %v1602_v5, -inf }
 0x4b5   : > { %1607 = vmax.xlane.f32.xlu0 %v1606_v7 }
 0x4b7   : > { %1440 = vmax.xlane.f32.xlu1 %v1439_v8  ;;  %v1769_v9 = vpop.f32.mrb[12].mxu0 }
 0x4b8   : > { %v2580_v10 = vpop.f32.mrb[13].mxu0  ;;  %v1773_v11 = vsel %vm773_vm3, %v1769_v9, -inf }
 0x4bb   : > { %1774 = vmax.xlane.f32.xlu1 %v1773_v11  ;;  %v1936_v12 = vpop.f32.mrb[14].mxu0 }
 0x4bc   : > { %v2590_v13 = vpop.f32.mrb[15].mxu0  ;;  %v1940_v14 = vsel %vm773_vm3, %v1936_v12, -inf }
 0x4bd   : > { %1941 = vmax.xlane.f32.xlu0 %v1940_v14 }
 0x536   : > { %v1107_v15 = vpop.xlane.xlu0 %1106 }
 0x537   : > { %v1108_v16 = vsub.f32 %v1101_v54, %v1107_v15 }
 0x539   : > { %v1109_v17 = vmul.f32 1.442695, %v1108_v16 }
 0x53a   : > { %v1274_v18 = vpop.xlane.xlu0 %1273 }
 0x53b   : > { %2757 = vpow2.f32 %v1109_v17  ;;  %v1275_v19 = vsub.f32 %v1268_v57, %v1274_v18 }
 0x53d   : > { %v1276_v20 = vmul.f32 1.442695, %v1275_v19 }
 0x53f   : > { %2759 = vpow2.f32 %v1276_v20  ;;  %v2069_v20 = vld [vmem:[#allocation13] sm:$0xff] }
 0x540   : > { %v939_v21 = vpop.xlane.xlu1 %938 }
 0x541   : > { %v940_v47 = vsub.f32 %v3581_v2, %v939_v21  ;;  %v2070_v21 = vld [vmem:[#allocation13 + $0x8] sm:$0xff] }
 0x542   : > { %v1608_v22 = vpop.xlane.xlu0 %1607 }
 0x543   : > { %v1609_v23 = vsub.f32 %v1602_v5, %v1608_v22  ;;  %v941_v48 = vmul.f32 1.442695, %v940_v47 }
 0x544   : > { %v1441_v24 = vpop.xlane.xlu1 %1440 }
 0x545   : > { %v2758_v25 = vpop.eup %2757  ;;  %v1610_v26 = vmul.f32 1.442695, %v1609_v23  ;;  %v1442_v27 = vsub.f32 %v1435_v62, %v1441_v24  ;;  %v2626_v23 = vpack.c.bf16 %v2070_v21, %v2069_v20 }
 0x546   : > { %v1111_v28 = vsel %vm773_vm3, %v2758_v25, 0.0 }
 0x547   : > { %2761 = vpow2.f32 %v1610_v26  ;;  %v1443_v29 = vmul.f32 1.442695, %v1442_v27  ;;  %1112 = vadd.xlane.f32.xlu0 %v1111_v28  ;;  %2627 = vmatpush3.bf16.msra.mxu0 %v2626_v23 }
 0x548   : > { %v1775_v30 = vpop.xlane.xlu1 %1774  ;;  %2628 = vmatprep.subr.bf16.mxu0 %v3108_v0 }
 0x549   : > { %v2760_v31 = vpop.eup %2759  ;;  %2763 = vpow2.f32 %v1443_v29  ;;  %v1776_v32 = vsub.f32 %v1769_v9, %v1775_v30 }
 0x54a   : > { %v1942_v33 = vpop.xlane.xlu0 %1941  ;;  %v1278_v34 = vsel %vm773_vm3, %v2760_v31, 0.0 }
 0x54b   : > { %v1777_v36 = vmul.f32 1.442695, %v1776_v32  ;;  %v1943_v37 = vsub.f32 %v1936_v12, %v1942_v33  ;;  %1279 = vadd.xlane.f32.xlu1 %v1278_v34 }
 0x54d   : > { %2765 = vpow2.f32 %v1777_v36  ;;  %v1944_v38 = vmul.f32 1.442695, %v1943_v37 }
 0x54f   : > { %2767 = vpow2.f32 %v1944_v38 }
 0x550   : > { %2769 = vpow2.f32 %v941_v48 }
 0x551   : > { %v2762_v39 = vpop.eup %2761 }
 0x552   : > { %v1612_v40 = vsel %vm773_vm3, %v2762_v39, 0.0 }
 0x553   : > { %v2764_v41 = vpop.eup %2763  ;;  %1613 = vadd.xlane.f32.xlu1 %v1612_v40 }
 0x554   : > { %v1445_v42 = vsel %vm773_vm3, %v2764_v41, 0.0 }
 0x555   : > { %1446 = vadd.xlane.f32.xlu0 %v1445_v42 }
 0x557   : > { %v2766_v43 = vpop.eup %2765 }
 0x558   : > { %v1779_v44 = vsel %vm773_vm3, %v2766_v43, 0.0 }
 0x559   : > { %v2768_v45 = vpop.eup %2767  ;;  %1780 = vadd.xlane.f32.xlu0 %v1779_v44 }
 0x55a   : > { %v1946_v46 = vsel %vm773_vm3, %v2768_v45, 0.0  ;;  %v2770_v49 = vpop.eup %2769 }
 0x55b   : > { %1947 = vadd.xlane.f32.xlu1 %v1946_v46  ;;  %v943_v50 = vsel %vm773_vm3, %v2770_v49, 0.0 }
 0x56c   : > { %1118 = vrot.lane.b32.xlu1 %v3526_v35, %s3112_s15  ;;  %s2153_s15 = scalar_lea.sflag [#allocation16], %s3456_s17 }
 0x56f   : > { %951 = vrot.lane.b32.xlu0 %v3526_v35, %s3111_s20  ;;  %s3661_s20 = scalar_lea.hbm %s3808_s21, %s2430_s27 }
 0x573   : > { %1452 = vrot.lane.b32.xlu0 %v3526_v35, %s3114_s13  ;;  %s3125_s13 = smov [#allocation15]  }
 0x577   : > { %1786 = vrot.lane.b32.xlu0 %v3526_v35, %s3116_s25 }
 0x590   : > { %944 = vadd.xlane.f32.xlu1 %v943_v50 }
 0x5a1   : > { %1285 = vrot.lane.b32.xlu1 %v3526_v35, %s3113_s16  ;;  %s2987_s16 = scalar_lea.vmem %s3663_s12, 1024 }
 0x5a2   : > { %p2988_p9 = scmp.ne.s32.totalorder %s3663_s12, %s2987_s16 }
 0x5a4   : > { %p2989_p11 = pnand %p2988_p9, %p3809_p13 }
 0x5a5   : > { %1619 = vrot.lane.b32.xlu1 %v3526_v35, %s3115_s1  ;;  %s2991_s1 = sshll.u32 %s3125_s13, 4  ;;  %s2992_s1 = int_to_ptr.vmem [resolvable:$false] %s2991_s1 }
 0x5a6   : > { %p2990_p1 = pneg %p2989_p11  ;;  %s2993_s25 = scalar_lea.vmem %s2992_s1, 2048 }
 0x5a7   : > { %p2994_p6 = scmp.lt.s32.totalorder %s3663_s12, %s2992_s1  ;;  %p2995_p5 = scmp.lt.s32.totalorder %s2993_s25, %s2987_s16 }
 0x5a9   : > { %1953 = vrot.lane.b32.xlu1 %v3526_v35, %s3117_s3  ;;  %p2996_p2 = por %p2995_p5, %p2994_p6 }
 0x5ab   : > { %p2997_p4 = pnand %p2996_p2, %p2990_p1 }
 0x5d4   : > { %v1113_v51 = vpop.xlane.xlu0 %1112 }
 0x5d5   : > { %2771 = vrcp.f32 %v1113_v51 }
 0x5d8   : > { %v1280_v52 = vpop.xlane.xlu1 %1279 }
 0x5d9   : > { %2773 = vrcp.f32 %v1280_v52 }
 0x5df   : > { %v2772_v53 = vpop.eup %2771 }
 0x5e0   : > { %v1115_v54 = vmul.f32 %v2772_v53, %v2758_v25  ;;  %v1614_v55 = vpop.xlane.xlu1 %1613  ;;  %v2071_v25 = vld [vmem:[#allocation13 + $0x10] sm:$0xff] }
 0x5e1   : > { %2775 = vrcp.f32 %v1614_v55 }
 0x5e2   : > { %2400 = vst.msk [vmem:[%s3546_s26 + $0x10] sm:$0xff] %vm773_vm3, %v1115_v54  ;;  %v1447_v56 = vpop.xlane.xlu0 %1446 }
 0x5e3   : > { %v2774_v57 = vpop.eup %2773  ;;  %2777 = vrcp.f32 %v1447_v56 }
 0x5e4   : > { %v1282_v58 = vmul.f32 %v2774_v57, %v2760_v31 }
 0x5e6   : > { %2404 = vst.msk [vmem:[%s3546_s26 + $0x18] sm:$0xff] %vm773_vm3, %v1282_v58  ;;  %v1781_v59 = vpop.xlane.xlu0 %1780 }
 0x5e7   : > { %2779 = vrcp.f32 %v1781_v59 }
 0x5e8   : > { %v1948_v35 = vpop.xlane.xlu1 %1947 }
 0x5e9   : > { %2781 = vrcp.f32 %v1948_v35 }
 0x5ea   : > { %v952_v61 = vpop.permute.xlu0 %951 }
 0x5eb   : > { %v2776_v62 = vpop.eup %2775  ;;  %2532 = vmatpush3.msra.mxu1 %v952_v61 }
 0x5ec   : > { %v1616_v63 = vmul.f32 %v2776_v62, %v2762_v39  ;;  %2541 = vmatprep.subr.mxu1 %v3110_v1  ;;  %v1119_v8 = vpop.permute.xlu1 %1118 }
 0x5ed   : > { %v2778_v2 = vpop.eup %2777 }
 0x5ee   : > { %2412 = vst.msk [vmem:[%s3546_s26 + $0x28] sm:$0xff] %vm773_vm3, %v1616_v63  ;;  %v1449_v3 = vmul.f32 %v2778_v2, %v2764_v41  ;;  %v1453_v13 = vpop.permute.xlu0 %1452 }
 0x5f0   : > { %2408 = vst.msk [vmem:[%s3546_s26 + $0x20] sm:$0xff] %vm773_vm3, %v1449_v3 }
 0x5f1   : > { %v2780_v4 = vpop.eup %2779 }
 0x5f2   : > { %v1783_v5 = vmul.f32 %v2780_v4, %v2766_v43  ;;  %v1787_v15 = vpop.permute.xlu0 %1786 }
 0x5f3   : > { %v2782_v6 = vpop.eup %2781 }
 0x5f4   : > { %2416 = vst.msk [vmem:[%s3546_s26 + $0x30] sm:$0xff] %vm773_vm3, %v1783_v5  ;;  %v1950_v7 = vmul.f32 %v2782_v6, %v2768_v45 }
 0x5f6   : > { %2420 = vst.msk [vmem:[%s3546_s26 + $0x38] sm:$0xff] %vm773_vm3, %v1950_v7 }
 0x61d   : > { %v945_v9 = vpop.xlane.xlu1 %944 }
 0x61e   : > { %2783 = vrcp.f32 %v945_v9 }
 0x621   : > { %v1286_v12 = vpop.permute.xlu1 %1285 }
 0x625   : > { %v1620_v14 = vpop.permute.xlu1 %1619 }
 0x628   : > { %v2784_v10 = vpop.eup %2783 }
 0x629   : > { %v947_v11 = vmul.f32 %v2784_v10, %v2770_v49  ;;  %v1954_v16 = vpop.permute.xlu1 %1953 }
 0x62b   : > { %2396 = vst.msk [vmem:[%s3546_s26 + $0x8] sm:$0xff] %vm773_vm3, %v947_v11  ;;  %2534 = vmatmul.mubr.msk.f32.vlgmr.msra.gmra.mrb[8].mxu1 %vm773_vm3, %v947_v11 }
 0x62c   : > { %2542 = vmatpush3.msra.mxu1 %v1119_v8  ;;  %2543 = vmatprep.mubr.msk.f32.mxu1 %vm3109_vm0, %v3110_v1 }
 0x62d   : > { %2551 = vmatprep.subr.mxu1 %v3110_v1 }
 0x62f   : > { %2544 = vmatmul.mubr.msk.f32.vlgmr.msra.gmra.mrb[10].mxu1 %vm773_vm3, %v1115_v54 }
 0x630   : > { %2552 = vmatpush3.msra.mxu1 %v1286_v12  ;;  %2553 = vmatprep.mubr.msk.f32.mxu1 %vm3109_vm0, %v3110_v1 }
 0x631   : > { %2561 = vmatprep.subr.mxu1 %v3110_v1 }
 0x633   : > { %2554 = vmatmul.mubr.msk.f32.vlgmr.msra.gmra.mrb[12].mxu1 %vm773_vm3, %v1282_v58 }
 0x634   : > { %2562 = vmatpush3.msra.mxu1 %v1453_v13  ;;  %2563 = vmatprep.mubr.msk.f32.mxu1 %vm3109_vm0, %v3110_v1 }
 0x635   : > { %2571 = vmatprep.subr.mxu1 %v3110_v1 }
 0x637   : > { %2564 = vmatmul.mubr.msk.f32.vlgmr.msra.gmra.mrb[14].mxu1 %vm773_vm3, %v1449_v3 }
 0x638   : > { %2572 = vmatpush3.msra.mxu1 %v1620_v14  ;;  %2573 = vmatprep.mubr.msk.f32.mxu1 %vm3109_vm0, %v3110_v1 }
 0x639   : > { %2581 = vmatprep.subr.mxu1 %v3110_v1 }
 0x63b   : > { %2574 = vmatmul.mubr.msk.f32.vlgmr.msra.gmra.mrb[16].mxu1 %vm773_vm3, %v1616_v63 }
 0x63c   : > { %2582 = vmatpush3.msra.mxu1 %v1787_v15  ;;  %2583 = vmatprep.mubr.msk.f32.mxu1 %vm3109_vm0, %v3110_v1 }
 0x63d   : > { %2591 = vmatprep.subr.mxu1 %v3110_v1 }
 0x63f   : > { %2584 = vmatmul.mubr.msk.f32.vlgmr.msra.gmra.mrb[18].mxu1 %vm773_vm3, %v1783_v5 }
 0x640   : > { %2592 = vmatpush3.msra.mxu1 %v1954_v16  ;;  %2593 = vmatprep.mubr.msk.f32.mxu1 %vm3109_vm0, %v3110_v1  ;;  %v2072_v1 = vld [vmem:[#allocation13 + $0x18] sm:$0xff] }
 0x641   : > { %v2629_v27 = vpack.c.bf16 %v2072_v1, %v2071_v25 }
 0x643   : > { %2594 = vmatmul.mubr.msk.f32.vlgmr.msra.gmra.mrb[20].mxu1 %vm773_vm3, %v1950_v7  ;;  %2630 = vmatpush3.bf16.msra.mxu0 %v2629_v27 }
 0x6fe   : > { %v1023_v17 = vpop.f32.mrb[8].mxu1 }
 0x6ff   : > { %2030 = vrot.lane.b32.xlu0 %v1023_v17, %s3118_s30  ;;  %v2535_v18 = vpop.f32.mrb[9].mxu1 }
 0x702   : > { %v1190_v19 = vpop.f32.mrb[10].mxu1 }
 0x703   : > { %2034 = vrot.lane.b32.xlu1 %v1190_v19, %s3119_s18  ;;  %v2545_v22 = vpop.f32.mrb[11].mxu1 }
 0x706   : > { %v1357_v24 = vpop.f32.mrb[12].mxu1 }
 0x707   : > { %2038 = vrot.lane.b32.xlu0 %v1357_v24, %s3120_s10  ;;  %v2555_v26 = vpop.f32.mrb[13].mxu1 }
 0x70a   : > { %v1524_v28 = vpop.f32.mrb[14].mxu1 }
 0x70b   : > { %2042 = vrot.lane.b32.xlu1 %v1524_v28, %s3121_s24  ;;  %v2565_v29 = vpop.f32.mrb[15].mxu1 }
 0x70e   : > { %v1691_v30 = vpop.f32.mrb[16].mxu1 }
 0x70f   : > { %2046 = vrot.lane.b32.xlu0 %v1691_v30, %s3122_s23  ;;  %v2575_v31 = vpop.f32.mrb[17].mxu1 }
 0x712   : > { %v1858_v32 = vpop.f32.mrb[18].mxu1 }
 0x713   : > { %2050 = vrot.lane.b32.xlu1 %v1858_v32, %s3123_s5  ;;  %v2585_v33 = vpop.f32.mrb[19].mxu1 }
 0x716   : > { %v2025_v0 = vpop.f32.mrb[20].mxu1 }
 0x717   : > { %2054 = vrot.lane.b32.xlu0 %v2025_v0, %s3124_s8  ;;  %v2595_v34 = vpop.f32.mrb[21].mxu1 }
 0x771   : > { %v2031_v36 = vpop.permute.xlu0 %2030 }
 0x772   : > { %v2057_v40 = vsel %vm696_vm2, %v3579_v60, %v2031_v36 }
 0x775   : > { %v2035_v37 = vpop.permute.xlu1 %2034 }
 0x776   : > { %v2058_v41 = vsel %vm773_vm3, %v2057_v40, %v2035_v37 }
 0x779   : > { %v2039_v38 = vpop.permute.xlu0 %2038 }
 0x77a   : > { %v2060_v43 = vsel %vm2059_vm4, %v2058_v41, %v2039_v38 }
 0x77d   : > { %v2043_v39 = vpop.permute.xlu1 %2042 }
 0x77e   : > { %v2062_v45 = vsel %vm2061_vm5, %v2060_v43, %v2043_v39 }
 0x781   : > { %v2047_v42 = vpop.permute.xlu0 %2046 }
 0x782   : > { %v2064_v46 = vsel %vm2063_vm6, %v2062_v45, %v2047_v42 }
 0x785   : > { %v2051_v44 = vpop.permute.xlu1 %2050 }
 0x786   : > { %v2066_v47 = vsel %vm2065_vm7, %v2064_v46, %v2051_v44 }
 0x789   : > { %v2055_v48 = vpop.permute.xlu0 %2054 }
 0x78a   : > { %v2068_v49 = vsel %vm2067_vm8, %v2066_v47, %v2055_v48 }
 0x78b   : > { %2605 = vmatmul.mubr.msk.f32.vlgmr.msra.gmra.mrb[16].mxu0 %vm468_vm1, %v2068_v49 }
 0x78c   : > { %3000 = shalt.err (!%p2997_p4)
}
 0x78d   : > { %s3001_s3 = scalar_lea.hbm %s3661_s20, 1024  ;;  %s3005_s30 = scalar_lea.hbm %s3808_s21, 2048 }
 0x78e   : > { %p3002_p10 = scmp.ne.s32.totalorder %s3661_s20, %s3001_s3  ;;  %p3006_p12 = scmp.lt.u32.totalorder %s3661_s20, %s3808_s21 }
 0x78f   : > { %p3007_p0 = scmp.lt.u32.totalorder %s3005_s30, %s3001_s3  ;;  %p3009_p9 = scmp.lt.u32.totalorder %s3001_s3, %s3661_s20 }
 0x790   : > { %p3003_p3 = pnand %p3002_p10, %p3809_p13 }
 0x791   : > { %p3008_p7 = por %p3007_p0, %p3006_p12 }
 0x792   : > { %p3004_p8 = pneg %p3003_p3 }
 0x793   : > { %p3010_p11 = por %p3009_p9, %p3008_p7 }
 0x795   : > { %p3011_p1 = pnand %p3010_p11, %p3004_p8 }
 0x797   : > { %3014 = shalt.err (!%p3011_p1)
}
 0x798   : > { %s3126_s23 = smov 128   ;;  %s2425_s5 = sshll.u32 %s3194_s11, 7 }
 0x799   : > { %2654 = dma.vmem_to_hbm [thread:$0]  (%p3809_p13), %s3663_s12, 1024, %s3661_s20, %s2153_s15, %s3126_s23, %s3126_s23, %s3119_s18  }
 0x79a   : > { %s453_s8 = scalar_lea.vmem [#allocation14], %s3459_s7  ;;  %s3810_s16 = sld [smem:[#allocation31_spill]] }
 0x79b   : > { %s2166_s27 = sshll.u32 %s453_s8, 4  ;;  %s2148_s1 = scalar_lea.sflag [#allocation4], %s3456_s17  ;;  %s3697_s27 = int_to_ptr.vmem [resolvable:$true] %s2166_s27 }
 0x79c   : > { %s3015_s25 = scalar_lea.vmem %s3697_s27, 128  ;;  %s3127_s11 = smov [#allocation14]  }
 0x79d   : > { %p3016_p6 = scmp.ne.s32.totalorder %s3697_s27, %s3015_s25  ;;  %s3019_s7 = sshll.u32 %s3127_s11, 4  ;;  %s3020_s7 = int_to_ptr.vmem [resolvable:$false] %s3019_s7 }
 0x79e   : > { %s3021_s18 = scalar_lea.vmem %s3020_s7, 256  ;;  %p3022_p4 = scmp.lt.s32.totalorder %s3697_s27, %s3020_s7 }
 0x79f   : > { %p3017_p5 = pnand %p3016_p6, %p3809_p13  ;;  %p3023_p10 = scmp.lt.s32.totalorder %s3021_s18, %s3015_s25 }
 0x7a0   : > { %s3695_s13 = scalar_lea.hbm %s3810_s16, %s2425_s5 }
 0x7a1   : > { %p3018_p2 = pneg %p3017_p5  ;;  %p3024_p3 = por %p3023_p10, %p3022_p4 }
 0x7a3   : > { %p3025_p8 = pnand %p3024_p3, %p3018_p2 }
 0x85e   : > { %v2142_v60 = vpop.f32.mrb[16].mxu0 }
 0x85f   : > { %2146 = vst.msk [vmem:[%s453_s8] sm:$0xff] %vm468_vm1, %v2142_v60  ;;  %v2606_v50 = vpop.f32.mrb[17].mxu0 }
 0x860   : > { %3028 = shalt.err (!%p3025_p8)
}
 0x861   : > { %s3029_s17 = scalar_lea.hbm %s3695_s13, 128  ;;  %s3033_s15 = scalar_lea.hbm %s3810_s16, 256 }
 0x862   : > { %p3030_p12 = scmp.ne.s32.totalorder %s3695_s13, %s3029_s17  ;;  %p3034_p9 = scmp.lt.u32.totalorder %s3695_s13, %s3810_s16 }
 0x863   : > { %p3035_p11 = scmp.lt.u32.totalorder %s3033_s15, %s3029_s17  ;;  %p3037_p6 = scmp.lt.u32.totalorder %s3029_s17, %s3695_s13 }
 0x864   : > { %p3031_p0 = pnand %p3030_p12, %p3809_p13 }
 0x865   : > { %p3036_p1 = por %p3035_p11, %p3034_p9 }
 0x866   : > { %p3032_p7 = pneg %p3031_p0 }
 0x867   : > { %p3038_p5 = por %p3037_p6, %p3036_p1 }
 0x869   : > { %p3039_p2 = pnand %p3038_p5, %p3032_p7 }
 0x86b   : > { %3042 = shalt.err (!%p3039_p2)
}
 0x86c   : > { %2653 = dma.vmem_to_hbm [thread:$0]  (%p3809_p13), %s3697_s27, 128, %s3695_s13, %s2148_s1  }
 0x86d PF: > { %s3811_s26 = sld [smem:[#allocation23_spill]]  ;;  %s3812_s30 = sld [smem:[#allocation27_spill]] }
 0x86e   : > { %s3813_s10 = sld [smem:[#allocation24_spill]] }
 0x873   : > { %s2194_s24 = sand.u32 1, %s3811_s26   ;;  %p3814_p4 = scmp.ne.s32.totalorder %s3812_s30, 0 }
 0x874   : > { %p3815_p10 = scmp.ge.s32.totalorder %s3813_s10, 2  ;;  %s2195_s23 = scalar_lea.sflag [#allocation4], %s2194_s24 }
 0x876   : > { %p2681_p3 = pnand %p3815_p10, %p3814_p4 }
 0x878   : > { %3076 = dma.done.wait (!%p2681_p3), %s2195_s23, 128  }
 0x879   : > { %3078 = vsyncadd (!%p2681_p3), %s2195_s23, 4294967168  ;;  %s2204_s5 = scalar_lea.sflag [#allocation16], %s2194_s24 }
 0x87a   : > { %3080 = dma.done.wait (!%p2681_p3), %s2204_s5, 1024  }
 0x87b   : > { %3082 = vsyncadd (!%p2681_p3), %s2204_s5, 4294966272  ;;  %s3816_s30 = sld [smem:[#allocation25_spill]]  ;;  %s3817_s22 = sld [smem:[#allocation26_spill]] }
 0x87c   : > { %s3818_s27 = smov %s3089_s28  ;;  %s3819_s28 = smov %s3093_s29 }
 0x881   : > { %p30_p13 = scmp.ge.s32.totalorder %s3816_s30, 4   ;;  %s3820_s29 = smov %s3817_s22 }
 0x883   :  { %32 = sbr.rel (!%p30_p13) target bundleno = 17 (0x11), region = 157 }
 0x88a   :  { %2209 = vsyncpa [#allocation3], 1 }
 0x88b   :  { %2211 = vsyncpa [#allocation3 + $0x1], 1 }
 0x88c   :  { %2212 = vsyncpa [#allocation6], 1 }
 0x88d   :  { %2214 = vsyncpa [#allocation6 + $0x1], 1 }
 0x88e   :  { %2215 = vsyncpa [#allocation9], 1 }
 0x88f   :  { %2216 = vsyncpa [#allocation12], 1 }
 0x890   :  { %2217 = vsyncpa [#allocation4], 1 }
 0x891   :  { %2219 = vsyncpa [#allocation4 + $0x1], 1 }
 0x892   :  { %2220 = vsyncpa [#allocation16], 1 }
 0x893   :  { %2222 = vsyncpa [#allocation16 + $0x1], 1 }

</bundles_post_ra>
